<compile_context>
chip_gen: v7x
topology: tpu7x:2x2x1
jax: 0.10.0
libtpu: 0.0.40
codegen_flags: <defaults>
</compile_context>

<pallas_src>
import math
import functools

import jax
import jax.numpy as jnp
from jax.experimental import pallas as pl
from jax.experimental.pallas import tpu as pltpu


# --------------------------------------------------------------- helpers ----

def _layernorm(x, g, b, eps):
    mean = jnp.mean(x, axis=-1, keepdims=True)
    var = jnp.mean(jnp.square(x - mean), axis=-1, keepdims=True)
    return (x - mean) * jax.lax.rsqrt(var + eps) * g + b


# ------------------------------------------- fused encoder stack (n layers) -

def _encoder_stack_kernel(len_ref, x_ref, cond_ref,
                          wqkv_ref, bqkv_ref, wo_ref, bo_ref,
                          g1_ref, be1_ref,
                          w1_ref, b1_ref, w2_ref, b2_ref,
                          g2_ref, be2_ref,
                          o_ref, qkv_ref, *,
                          n_heads, ksize, eps):
    b = pl.program_id(0)
    l = pl.program_id(1)
    n_layers = pl.num_programs(1)
    seq_len = len_ref[b]

    T, H = o_ref.shape[1], o_ref.shape[2]
    dk = H // n_heads
    scale = 1.0 / math.sqrt(dk)

    # (T,1)/(1,T) validity from the length scalar -- no (T,T) int32 iotas.
    t_col = jax.lax.broadcasted_iota(jnp.int32, (T, 1), 0)
    t_row = jax.lax.broadcasted_iota(jnp.int32, (1, T), 1)
    valid_col = t_col < seq_len
    mask_col = valid_col.astype(jnp.float32)                    # (T, 1)
    attn_valid = valid_col & (t_row < seq_len)                  # (T, T) bool

    # encoder entry (layer 0 only): mask the input and add the conditioning
    # vector (zeros for encoder 1).  x then stays VMEM-resident in o_ref
    # across the layer axis (output block index ignores l).
    @pl.when(l == 0)
    def _():
        o_ref[...] = ((x_ref[0] + cond_ref[0]) * mask_col)[None]

    x = o_ref[0]                                                # (T, H) f32
    xb = x.astype(jnp.bfloat16)

    # ---- multi-head self-attention (fused QKV, per-head out-proj accum) ----
    # QKV written once to a bf16 VMEM scratch; heads sliced from the ref.
    qkv_ref[...] = (jnp.dot(xb, wqkv_ref[0].astype(jnp.bfloat16),
                            preferred_element_type=jnp.float32)
                    + bqkv_ref[0]).astype(jnp.bfloat16)
    wo = wo_ref[0].astype(jnp.bfloat16)
    y = jnp.zeros((T, H), jnp.float32) + bo_ref[0]
    for h in range(n_heads):                                    # static loop
        q = qkv_ref[:, h * dk:(h + 1) * dk]
        k = qkv_ref[:, H + h * dk:H + (h + 1) * dk]
        v = qkv_ref[:, 2 * H + h * dk:2 * H + (h + 1) * dk]
        scores = jax.lax.dot_general(q, k, (((1,), (1,)), ((), ())),
                                     preferred_element_type=jnp.float32) * scale
        scores = jnp.where(attn_valid, scores, jnp.float32(-1e4))
        p = jnp.exp(scores - jnp.max(scores, axis=-1, keepdims=True))
        p = p * pl.reciprocal(jnp.sum(p, axis=-1, keepdims=True), approx=True)
        ctx = jnp.dot(p.astype(jnp.bfloat16), v,
                      preferred_element_type=jnp.float32)       # (T, dk)
        # out-projection accumulated per head: avoids a lane-axis concat
        y = y + jnp.dot(ctx.astype(jnp.bfloat16),
                        wo[h * dk:(h + 1) * dk, :],
                        preferred_element_type=jnp.float32)
    x = _layernorm(x + y, g1_ref[0], be1_ref[0], eps)

    # ---- FFN: K-tap 'same' conv1 + ReLU, conv2; masks fused ----------------
    pad_l = (ksize - 1) // 2

    def conv_same(xin, w_ref, bias_ref):
        cout = w_ref.shape[-1]
        acc = jnp.zeros((T, cout), jnp.float32) + bias_ref[0]
        for j in range(ksize):                                  # static taps
            off = j - pad_l
            if off == 0:
                xs = xin
            else:
                # time shift via sublane roll (XLU slot) + zeroing of the
                # wrapped boundary rows; replaces the (T,T) selection matmuls.
                xs = pltpu.roll(xin, shift=(-off) % T, axis=0)
                in_rng = (t_col + off >= 0) & (t_col + off < T)
                xs = jnp.where(in_rng, xs, 0.0)
            acc = acc + jnp.dot(xs.astype(jnp.bfloat16),
                                w_ref[0, j].astype(jnp.bfloat16),
                                preferred_element_type=jnp.float32)
        return acc

    h1 = jnp.maximum(conv_same(x * mask_col, w1_ref, b1_ref), 0.0)
    y = conv_same(h1 * mask_col, w2_ref, b2_ref) * mask_col
    x = _layernorm(x + y, g2_ref[0], be2_ref[0], eps)

    # encoder exit mask on the last layer
    x = jnp.where(l == n_layers - 1, x * mask_col, x)
    o_ref[...] = x[None]


def encoder_stack(x, lengths, cond, lp, *, n_heads, ksize):
    """All n_layers of one attentions.Encoder as a single pallas_call.

    grid = (B, n_layers); the output block index ignores the layer axis so x
    stays VMEM-resident across layers (one HBM round trip per encoder), while
    per-layer weights (stacked along a leading layer axis) stream in per step.
    """
    B, T, H = x.shape
    L, K, F = lp["w1"].shape[0], lp["w1"].shape[1], lp["w1"].shape[-1]

    kern = functools.partial(_encoder_stack_kernel, n_heads=n_heads,
                             ksize=K, eps=1e-5)

    def wspec(shape):        # per-layer weight block, selected by the l axis
        shape = tuple(shape)
        zeros = (0,) * len(shape)

        def imap(b, l, lens):
            return (l,) + zeros
        return pl.BlockSpec((1,) + shape, imap)

    def xspec(shape):        # per-batch block, constant across the layer axis
        shape = tuple(shape)
        zeros = (0,) * len(shape)

        def imap(b, l, lens):
            return (b,) + zeros
        return pl.BlockSpec((1,) + shape, imap)

    return pl.pallas_call(
        kern,
        out_shape=jax.ShapeDtypeStruct((B, T, H), jnp.float32),
        grid_spec=pltpu.PrefetchScalarGridSpec(
            num_scalar_prefetch=1, grid=(B, L),
            in_specs=[
                xspec((T, H)),                       # x (layer-0 input)
                xspec((1, H)),                       # cond (zeros for enc 1)
                wspec((H, 3 * H)), wspec((1, 3 * H)),
                wspec((H, H)), wspec((1, H)),
                wspec((1, H)), wspec((1, H)),
                wspec((K, H, F)), wspec((1, F)),
                wspec((K, F, H)), wspec((1, H)),
                wspec((1, H)), wspec((1, H)),
            ],
            out_specs=xspec((T, H)),
            scratch_shapes=[pltpu.VMEM((T, 3 * H), jnp.bfloat16)]),
        compiler_params=pltpu.CompilerParams(
            dimension_semantics=("parallel", "arbitrary"),
            vmem_limit_bytes=32 * 1024 * 1024),
    )(lengths, x, cond,
      lp["wqkv"], lp["bqkv"], lp["wo"], lp["bo"],
      lp["g1"], lp["be1"],
      lp["w1"], lp["b1"], lp["w2"], lp["b2"],
      lp["g2"], lp["be2"])


# -------------------------------------------------- small pointwise convs ---

def _pointwise_kernel(x_ref, w_ref, b_ref, o_ref):
    o_ref[...] = (jnp.dot(x_ref[...].astype(jnp.bfloat16),
                          w_ref[...].astype(jnp.bfloat16),
                          preferred_element_type=jnp.float32) + b_ref[...])


def pointwise_conv(x2d, w, b):
    """1x1 Conv1d as one single-program matmul: (N, Cin) @ (Cin, Cout) + b."""
    N, Cin = x2d.shape
    Cout = w.shape[1]
    return pl.pallas_call(
        _pointwise_kernel,
        out_shape=jax.ShapeDtypeStruct((N, Cout), jnp.float32),
        grid=(1,),
        in_specs=[pl.BlockSpec((N, Cin), lambda i: (0, 0)),
                  pl.BlockSpec((Cin, Cout), lambda i: (0, 0)),
                  pl.BlockSpec((1, Cout), lambda i: (0, 0))],
        out_specs=pl.BlockSpec((N, Cout), lambda i: (0, 0)),
    )(x2d, w, b)


def _proj_kernel(len_ref, x_ref, w_ref, b_ref, o_ref):
    i = pl.program_id(0)
    seq_len = len_ref[i]
    T = x_ref.shape[1]
    t_col = jax.lax.broadcasted_iota(jnp.int32, (T, 1), 0)
    mask_col = (t_col < seq_len).astype(jnp.float32)
    y = jnp.dot(x_ref[0].astype(jnp.bfloat16), w_ref[...].astype(jnp.bfloat16),
                preferred_element_type=jnp.float32) + b_ref[...]
    o_ref[...] = (y * mask_col)[None]


def proj_masked(x, lengths, w, b):
    """1x1 Conv1d followed by the x_mask multiply (mask built in-kernel)."""
    B, T, Cin = x.shape
    Cout = w.shape[1]
    return pl.pallas_call(
        _proj_kernel,
        out_shape=jax.ShapeDtypeStruct((B, T, Cout), jnp.float32),
        grid_spec=pltpu.PrefetchScalarGridSpec(
            num_scalar_prefetch=1, grid=(B,),
            in_specs=[pl.BlockSpec((1, T, Cin), lambda i, lens: (i, 0, 0)),
                      pl.BlockSpec((Cin, Cout), lambda i, lens: (0, 0)),
                      pl.BlockSpec((1, Cout), lambda i, lens: (0, 0))],
            out_specs=pl.BlockSpec((1, T, Cout), lambda i, lens: (i, 0, 0))),
        compiler_params=pltpu.CompilerParams(dimension_semantics=("parallel",)),
    )(lengths, x, w, b)


# ------------------------------------------------------------ module glue ---

def text_encoder_apply(tokens, x_lengths, g, params, cfg):
    H = cfg["hidden"]
    O = cfg["out_channels"]
    nh = cfg["n_heads"]
    K = cfg["kernel_size"]
    B, T = tokens.shape
    lengths = x_lengths.astype(jnp.int32)

    # embedding gather + sqrt scale (XLA glue)
    x = params["emb"][tokens] * math.sqrt(H)                    # (B, T, H)

    # encoder 1 (no conditioning): all layers fused in one pallas_call
    zero_cond = jnp.zeros((B, 1, H), jnp.float32)
    x = encoder_stack(x, lengths, zero_cond, params["enc1"],
                      n_heads=nh, ksize=K)

    # cond(g) 1x1 conv; residual add folded into encoder 2's first layer
    cond = pointwise_conv(g.reshape(B, -1), params["cond_w"],
                          params["cond_b"]).reshape(B, 1, H)
    x = encoder_stack(x, lengths, cond, params["enc2"],
                      n_heads=nh, ksize=K)

    stats = proj_masked(x, lengths, params["proj_w"], params["proj_b"])
    m, logs = stats[..., :O], stats[..., O:]

    x_mask = (jnp.arange(T)[None, :] < lengths[:, None]).astype(jnp.float32)
    # return in PyTorch layout: x/m/logs -> (B, C, T), x_mask -> (B, 1, T)
    return (x.transpose(0, 2, 1), m.transpose(0, 2, 1),
            logs.transpose(0, 2, 1), x_mask[:, None, :])


# -------------------------------------------------------------- parameters --

def init_params(key, cfg):
    H, F, K = cfg["hidden"], cfg["filter"], cfg["kernel_size"]
    O, V, L = cfg["out_channels"], cfg["n_vocab"], cfg["n_layers"]
    keys = iter(jax.random.split(key, 16))

    def nrm(shape, std=0.02):
        return jax.random.normal(next(keys), shape, jnp.float32) * std

    def zeros(shape):
        return jnp.zeros(shape, jnp.float32)

    def ones(shape):
        return jnp.ones(shape, jnp.float32)

    def make_encoder():
        # per-layer weights stacked along a leading layer axis (streamed per
        # grid step inside the fused encoder kernel)
        return dict(
            wqkv=nrm((L, H, 3 * H)), bqkv=zeros((L, 1, 3 * H)),   # fused q|k|v
            wo=nrm((L, H, H)), bo=zeros((L, 1, H)),
            g1=ones((L, 1, H)), be1=zeros((L, 1, H)),
            w1=nrm((L, K, H, F)), b1=zeros((L, 1, F)),
            w2=nrm((L, K, F, H)), b2=zeros((L, 1, H)),
            g2=ones((L, 1, H)), be2=zeros((L, 1, H)),
        )

    return {
        "emb": nrm((V, H), std=H ** (-0.5)),      # nn.init.normal_(.., H^-0.5)
        "cond_w": nrm((256, H)), "cond_b": zeros((1, H)),
        "proj_w": nrm((H, 2 * O)), "proj_b": zeros((1, 2 * O)),
        "enc1": make_encoder(),
        "enc2": make_encoder(),
    }


# -------------------------------------------------------------------- main --

if __name__ == "__main__":
    cfg = dict(n_vocab=40, out_channels=8, hidden=32, filter=64,
               n_heads=2, n_layers=2, kernel_size=3, p_dropout=0.0)
    assert cfg["hidden"] % cfg["n_heads"] == 0

    key = jax.random.PRNGKey(0)
    kp, kt, kg = jax.random.split(key, 3)
    params = init_params(kp, cfg)

    B, T = 2, 16
    tokens = jax.random.randint(kt, (B, T), 0, cfg["n_vocab"], dtype=jnp.int32)
    x_lengths = jnp.array([16, 11], dtype=jnp.int32)
    g = jax.random.normal(kg, (B, 1, 256), jnp.float32)   # PyTorch g: (B, 256, 1)

    outs = text_encoder_apply(tokens, x_lengths, g, params, cfg)
    outs = jax.block_until_ready(outs)

    x_out, m_out, logs_out, mask_out = outs
    assert x_out.shape == (B, cfg["hidden"], T)
    assert m_out.shape == (B, cfg["out_channels"], T)
    assert logs_out.shape == (B, cfg["out_channels"], T)
    assert mask_out.shape == (B, 1, T)
    print("KERNEL_OK")
</pallas_src>

<mosaic_0001>
module attributes {stable_mosaic.version = 11 : i64} {
  func.func @_encoder_stack_kernel(%arg0: i32, %arg1: i32, %arg2: memref<2xi32, #tpu.memory_space<smem>>, %arg3: memref<1x16x32xf32, #tpu.memory_space<vmem>>, %arg4: memref<1x1x32xf32, #tpu.memory_space<vmem>>, %arg5: memref<1x32x96xf32, #tpu.memory_space<vmem>>, %arg6: memref<1x1x96xf32, #tpu.memory_space<vmem>>, %arg7: memref<1x32x32xf32, #tpu.memory_space<vmem>>, %arg8: memref<1x1x32xf32, #tpu.memory_space<vmem>>, %arg9: memref<1x1x32xf32, #tpu.memory_space<vmem>>, %arg10: memref<1x1x32xf32, #tpu.memory_space<vmem>>, %arg11: memref<1x3x32x64xf32, #tpu.memory_space<vmem>>, %arg12: memref<1x1x64xf32, #tpu.memory_space<vmem>>, %arg13: memref<1x3x64x32xf32, #tpu.memory_space<vmem>>, %arg14: memref<1x1x32xf32, #tpu.memory_space<vmem>>, %arg15: memref<1x1x32xf32, #tpu.memory_space<vmem>>, %arg16: memref<1x1x32xf32, #tpu.memory_space<vmem>>, %arg17: memref<1x16x32xf32, #tpu.memory_space<vmem>>, %arg18: memref<16x96xbf16, #tpu.memory_space<vmem>>) attributes {dimension_semantics = [#tpu.dimension_semantics<parallel>, #tpu.dimension_semantics<arbitrary>], iteration_bounds = array<i64: 2, 2>, scalar_prefetch = 1 : i64, scratch_operands = 1 : i64, tpu.core_type = #tpu.core_type<tc>, window_params = [{transform_indices = @transform_0, window_bounds = array<i64: 1, 16, 32>}, {transform_indices = @transform_1, window_bounds = array<i64: 1, 1, 32>}, {transform_indices = @transform_2, window_bounds = array<i64: 1, 32, 96>}, {transform_indices = @transform_3, window_bounds = array<i64: 1, 1, 96>}, {transform_indices = @transform_4, window_bounds = array<i64: 1, 32, 32>}, {transform_indices = @transform_5, window_bounds = array<i64: 1, 1, 32>}, {transform_indices = @transform_6, window_bounds = array<i64: 1, 1, 32>}, {transform_indices = @transform_7, window_bounds = array<i64: 1, 1, 32>}, {transform_indices = @transform_8, window_bounds = array<i64: 1, 3, 32, 64>}, {transform_indices = @transform_9, window_bounds = array<i64: 1, 1, 64>}, {transform_indices = @transform_10, window_bounds = array<i64: 1, 3, 64, 32>}, {transform_indices = @transform_11, window_bounds = array<i64: 1, 1, 32>}, {transform_indices = @transform_12, window_bounds = array<i64: 1, 1, 32>}, {transform_indices = @transform_13, window_bounds = array<i64: 1, 1, 32>}, {transform_indices = @transform_14, window_bounds = array<i64: 1, 16, 32>}]} {
    %0 = arith.index_cast %arg0 : i32 to index
    %1 = memref.load %arg2[%0] : memref<2xi32, #tpu.memory_space<smem>>
    %2 = tpu.iota {dimensions = array<i32: 0>} : vector<16x1xi32>
    %3 = tpu.iota {dimensions = array<i32: 1>} : vector<1x16xi32>
    %4 = vector.broadcast %1 : i32 to vector<16x1xi32>
    %5 = arith.cmpi slt, %2, %4 : vector<16x1xi32>
    %6 = arith.extui %5 : vector<16x1xi1> to vector<16x1xi32>
    %7 = arith.sitofp %6 : vector<16x1xi32> to vector<16x1xf32>
    %8 = vector.broadcast %1 : i32 to vector<1x16xi32>
    %9 = arith.cmpi slt, %3, %8 : vector<1x16xi32>
    %10 = vector.broadcast %5 : vector<16x1xi1> to vector<16x16xi1>
    %11 = vector.broadcast %9 : vector<1x16xi1> to vector<16x16xi1>
    %12 = arith.andi %10, %11 : vector<16x16xi1>
    %c0_i32 = arith.constant 0 : i32
    %13 = arith.cmpi eq, %arg1, %c0_i32 : i32
    %14 = arith.extui %13 : i1 to i32
    %c0_i32_0 = arith.constant 0 : i32
    %15 = arith.cmpi ne, %14, %c0_i32_0 : i32
    scf.if %15 {
      %c0_122 = arith.constant 0 : index
      %c0_123 = arith.constant 0 : index
      %c0_124 = arith.constant 0 : index
      %255 = vector.load %arg3[%c0_122, %c0_123, %c0_124] : memref<1x16x32xf32, #tpu.memory_space<vmem>>, vector<1x16x32xf32>
      %256 = vector.shape_cast %255 : vector<1x16x32xf32> to vector<16x32xf32>
      %c0_125 = arith.constant 0 : index
      %c0_126 = arith.constant 0 : index
      %c0_127 = arith.constant 0 : index
      %257 = vector.load %arg4[%c0_125, %c0_126, %c0_127] : memref<1x1x32xf32, #tpu.memory_space<vmem>>, vector<1x1x32xf32>
      %258 = vector.shape_cast %257 : vector<1x1x32xf32> to vector<1x32xf32>
      %259 = vector.broadcast %258 : vector<1x32xf32> to vector<16x32xf32>
      %260 = arith.addf %256, %259 : vector<16x32xf32>
      %261 = vector.broadcast %7 : vector<16x1xf32> to vector<16x32xf32>
      %262 = arith.mulf %260, %261 : vector<16x32xf32>
      %263 = vector.shape_cast %262 : vector<16x32xf32> to vector<1x16x32xf32>
      %c0_128 = arith.constant 0 : index
      %c0_129 = arith.constant 0 : index
      %c0_130 = arith.constant 0 : index
      %264 = vector.load %arg17[%c0_128, %c0_129, %c0_130] : memref<1x16x32xf32, #tpu.memory_space<vmem>>, vector<1x16x32xf32>
      tpu.vector_store %arg17[%c0_128, %c0_129, %c0_130], %263 {strides = array<i32>} : memref<1x16x32xf32, #tpu.memory_space<vmem>>, vector<1x16x32xf32>,
    } else {
    }
    %c0 = arith.constant 0 : index
    %c0_1 = arith.constant 0 : index
    %c0_2 = arith.constant 0 : index
    %16 = vector.load %arg17[%c0, %c0_1, %c0_2] : memref<1x16x32xf32, #tpu.memory_space<vmem>>, vector<1x16x32xf32>
    %17 = vector.shape_cast %16 : vector<1x16x32xf32> to vector<16x32xf32>
    %18 = arith.truncf %17 : vector<16x32xf32> to vector<16x32xbf16>
    %c0_3 = arith.constant 0 : index
    %c0_4 = arith.constant 0 : index
    %c0_5 = arith.constant 0 : index
    %19 = vector.load %arg5[%c0_3, %c0_4, %c0_5] : memref<1x32x96xf32, #tpu.memory_space<vmem>>, vector<1x32x96xf32>
    %20 = vector.shape_cast %19 : vector<1x32x96xf32> to vector<32x96xf32>
    %21 = arith.truncf %20 : vector<32x96xf32> to vector<32x96xbf16>
    %cst = arith.constant dense<0.000000e+00> : vector<16x96xf32>
    %22 = tpu.matmul %18, %21, %cst {dimension_numbers = #tpu.dot_dimension_numbers<[1], [0], [0], [1], [0, 0, 1, 1], [], []>} : vector<16x32xbf16>, vector<32x96xbf16>, vector<16x96xf32> -> vector<16x96xf32>
    %c0_6 = arith.constant 0 : index
    %c0_7 = arith.constant 0 : index
    %c0_8 = arith.constant 0 : index
    %23 = vector.load %arg6[%c0_6, %c0_7, %c0_8] : memref<1x1x96xf32, #tpu.memory_space<vmem>>, vector<1x1x96xf32>
    %24 = vector.shape_cast %23 : vector<1x1x96xf32> to vector<1x96xf32>
    %25 = vector.broadcast %24 : vector<1x96xf32> to vector<16x96xf32>
    %26 = arith.addf %22, %25 : vector<16x96xf32>
    %27 = arith.truncf %26 : vector<16x96xf32> to vector<16x96xbf16>
    %c0_9 = arith.constant 0 : index
    %c0_10 = arith.constant 0 : index
    %28 = vector.load %arg18[%c0_9, %c0_10] : memref<16x96xbf16, #tpu.memory_space<vmem>>, vector<16x96xbf16>
    tpu.vector_store %arg18[%c0_9, %c0_10], %27 {strides = array<i32>} : memref<16x96xbf16, #tpu.memory_space<vmem>>, vector<16x96xbf16>,
    %c0_11 = arith.constant 0 : index
    %c0_12 = arith.constant 0 : index
    %c0_13 = arith.constant 0 : index
    %29 = vector.load %arg7[%c0_11, %c0_12, %c0_13] : memref<1x32x32xf32, #tpu.memory_space<vmem>>, vector<1x32x32xf32>
    %30 = vector.shape_cast %29 : vector<1x32x32xf32> to vector<32x32xf32>
    %31 = arith.truncf %30 : vector<32x32xf32> to vector<32x32xbf16>
    %cst_14 = arith.constant 0.000000e+00 : f32
    %32 = vector.broadcast %cst_14 : f32 to vector<16x32xf32>
    %c0_15 = arith.constant 0 : index
    %c0_16 = arith.constant 0 : index
    %c0_17 = arith.constant 0 : index
    %33 = vector.load %arg8[%c0_15, %c0_16, %c0_17] : memref<1x1x32xf32, #tpu.memory_space<vmem>>, vector<1x1x32xf32>
    %34 = vector.shape_cast %33 : vector<1x1x32xf32> to vector<1x32xf32>
    %35 = vector.broadcast %34 : vector<1x32xf32> to vector<16x32xf32>
    %36 = arith.addf %32, %35 : vector<16x32xf32>
    %c0_18 = arith.constant 0 : index
    %c0_19 = arith.constant 0 : index
    %37 = vector.load %arg18[%c0_18, %c0_19] : memref<16x96xbf16, #tpu.memory_space<vmem>>, vector<16x16xbf16>
    %c0_20 = arith.constant 0 : index
    %c32 = arith.constant 32 : index
    %38 = vector.load %arg18[%c0_20, %c32] : memref<16x96xbf16, #tpu.memory_space<vmem>>, vector<16x16xbf16>
    %c0_21 = arith.constant 0 : index
    %c64 = arith.constant 64 : index
    %39 = vector.load %arg18[%c0_21, %c64] : memref<16x96xbf16, #tpu.memory_space<vmem>>, vector<16x16xbf16>
    %cst_22 = arith.constant dense<0.000000e+00> : vector<16x16xf32>
    %40 = tpu.matmul %37, %38, %cst_22 {dimension_numbers = #tpu.dot_dimension_numbers<[1], [1], [0], [0], [0, 0, 1, 0], [], []>} : vector<16x16xbf16>, vector<16x16xbf16>, vector<16x16xf32> -> vector<16x16xf32>
    %cst_23 = arith.constant 2.500000e-01 : f32
    %41 = vector.broadcast %cst_23 : f32 to vector<16x16xf32>
    %42 = arith.mulf %40, %41 : vector<16x16xf32>
    %cst_24 = arith.constant -1.000000e+04 : f32
    %43 = vector.broadcast %cst_24 : f32 to vector<16x16xf32>
    %44 = arith.select %12, %42, %43 : vector<16x16xi1>, vector<16x16xf32>
    %cst_25 = arith.constant dense<0xFF800000> : vector<16xf32>
    %45 = vector.multi_reduction <maximumf>, %44, %cst_25 [1] : vector<16x16xf32> to vector<16xf32>
    %46 = vector.shape_cast %45 : vector<16xf32> to vector<16x1xf32>
    %47 = vector.broadcast %46 : vector<16x1xf32> to vector<16x16xf32>
    %48 = arith.subf %44, %47 : vector<16x16xf32>
    %49 = math.exp %48 : vector<16x16xf32>
    %cst_26 = arith.constant dense<0.000000e+00> : vector<16xf32>
    %50 = vector.multi_reduction <add>, %49, %cst_26 [1] : vector<16x16xf32> to vector<16xf32>
    %51 = vector.shape_cast %50 : vector<16xf32> to vector<16x1xf32>
    %52 = tpu.reciprocal %51 {approx = true} : vector<16x1xf32> -> vector<16x1xf32>
    %53 = vector.broadcast %52 : vector<16x1xf32> to vector<16x16xf32>
    %54 = arith.mulf %49, %53 : vector<16x16xf32>
    %55 = arith.truncf %54 : vector<16x16xf32> to vector<16x16xbf16>
    %cst_27 = arith.constant dense<0.000000e+00> : vector<16x16xf32>
    %56 = tpu.matmul %55, %39, %cst_27 {dimension_numbers = #tpu.dot_dimension_numbers<[1], [0], [0], [1], [0, 0, 1, 1], [], []>} : vector<16x16xbf16>, vector<16x16xbf16>, vector<16x16xf32> -> vector<16x16xf32>
    %57 = arith.truncf %56 : vector<16x16xf32> to vector<16x16xbf16>
    %58 = vector.extract_strided_slice %31 {offsets = [0, 0], sizes = [16, 32], strides = [1, 1]} : vector<32x32xbf16> to vector<16x32xbf16>
    %cst_28 = arith.constant dense<0.000000e+00> : vector<16x32xf32>
    %59 = tpu.matmul %57, %58, %cst_28 {dimension_numbers = #tpu.dot_dimension_numbers<[1], [0], [0], [1], [0, 0, 1, 1], [], []>} : vector<16x16xbf16>, vector<16x32xbf16>, vector<16x32xf32> -> vector<16x32xf32>
    %60 = arith.addf %36, %59 : vector<16x32xf32>
    %c0_29 = arith.constant 0 : index
    %c16 = arith.constant 16 : index
    %61 = vector.load %arg18[%c0_29, %c16] : memref<16x96xbf16, #tpu.memory_space<vmem>>, vector<16x16xbf16>
    %c0_30 = arith.constant 0 : index
    %c48 = arith.constant 48 : index
    %62 = vector.load %arg18[%c0_30, %c48] : memref<16x96xbf16, #tpu.memory_space<vmem>>, vector<16x16xbf16>
    %c0_31 = arith.constant 0 : index
    %c80 = arith.constant 80 : index
    %63 = vector.load %arg18[%c0_31, %c80] : memref<16x96xbf16, #tpu.memory_space<vmem>>, vector<16x16xbf16>
    %cst_32 = arith.constant dense<0.000000e+00> : vector<16x16xf32>
    %64 = tpu.matmul %61, %62, %cst_32 {dimension_numbers = #tpu.dot_dimension_numbers<[1], [1], [0], [0], [0, 0, 1, 0], [], []>} : vector<16x16xbf16>, vector<16x16xbf16>, vector<16x16xf32> -> vector<16x16xf32>
    %cst_33 = arith.constant 2.500000e-01 : f32
    %65 = vector.broadcast %cst_33 : f32 to vector<16x16xf32>
    %66 = arith.mulf %64, %65 : vector<16x16xf32>
    %cst_34 = arith.constant -1.000000e+04 : f32
    %67 = vector.broadcast %cst_34 : f32 to vector<16x16xf32>
    %68 = arith.select %12, %66, %67 : vector<16x16xi1>, vector<16x16xf32>
    %cst_35 = arith.constant dense<0xFF800000> : vector<16xf32>
    %69 = vector.multi_reduction <maximumf>, %68, %cst_35 [1] : vector<16x16xf32> to vector<16xf32>
    %70 = vector.shape_cast %69 : vector<16xf32> to vector<16x1xf32>
    %71 = vector.broadcast %70 : vector<16x1xf32> to vector<16x16xf32>
    %72 = arith.subf %68, %71 : vector<16x16xf32>
    %73 = math.exp %72 : vector<16x16xf32>
    %cst_36 = arith.constant dense<0.000000e+00> : vector<16xf32>
    %74 = vector.multi_reduction <add>, %73, %cst_36 [1] : vector<16x16xf32> to vector<16xf32>
    %75 = vector.shape_cast %74 : vector<16xf32> to vector<16x1xf32>
    %76 = tpu.reciprocal %75 {approx = true} : vector<16x1xf32> -> vector<16x1xf32>
    %77 = vector.broadcast %76 : vector<16x1xf32> to vector<16x16xf32>
    %78 = arith.mulf %73, %77 : vector<16x16xf32>
    %79 = arith.truncf %78 : vector<16x16xf32> to vector<16x16xbf16>
    %cst_37 = arith.constant dense<0.000000e+00> : vector<16x16xf32>
    %80 = tpu.matmul %79, %63, %cst_37 {dimension_numbers = #tpu.dot_dimension_numbers<[1], [0], [0], [1], [0, 0, 1, 1], [], []>} : vector<16x16xbf16>, vector<16x16xbf16>, vector<16x16xf32> -> vector<16x16xf32>
    %81 = arith.truncf %80 : vector<16x16xf32> to vector<16x16xbf16>
    %82 = vector.extract_strided_slice %31 {offsets = [16, 0], sizes = [16, 32], strides = [1, 1]} : vector<32x32xbf16> to vector<16x32xbf16>
    %cst_38 = arith.constant dense<0.000000e+00> : vector<16x32xf32>
    %83 = tpu.matmul %81, %82, %cst_38 {dimension_numbers = #tpu.dot_dimension_numbers<[1], [0], [0], [1], [0, 0, 1, 1], [], []>} : vector<16x16xbf16>, vector<16x32xbf16>, vector<16x32xf32> -> vector<16x32xf32>
    %84 = arith.addf %60, %83 : vector<16x32xf32>
    %85 = arith.addf %17, %84 : vector<16x32xf32>
    %c0_39 = arith.constant 0 : index
    %c0_40 = arith.constant 0 : index
    %c0_41 = arith.constant 0 : index
    %86 = vector.load %arg9[%c0_39, %c0_40, %c0_41] : memref<1x1x32xf32, #tpu.memory_space<vmem>>, vector<1x1x32xf32>
    %87 = vector.shape_cast %86 : vector<1x1x32xf32> to vector<1x32xf32>
    %c0_42 = arith.constant 0 : index
    %c0_43 = arith.constant 0 : index
    %c0_44 = arith.constant 0 : index
    %88 = vector.load %arg10[%c0_42, %c0_43, %c0_44] : memref<1x1x32xf32, #tpu.memory_space<vmem>>, vector<1x1x32xf32>
    %89 = vector.shape_cast %88 : vector<1x1x32xf32> to vector<1x32xf32>
    %cst_45 = arith.constant dense<0.000000e+00> : vector<16xf32>
    %90 = vector.multi_reduction <add>, %85, %cst_45 [1] : vector<16x32xf32> to vector<16xf32>
    %91 = vector.shape_cast %90 : vector<16xf32> to vector<16x1xf32>
    %cst_46 = arith.constant 3.200000e+01 : f32
    %92 = vector.broadcast %cst_46 : f32 to vector<16x1xf32>
    %93 = arith.divf %91, %92 : vector<16x1xf32>
    %94 = vector.broadcast %93 : vector<16x1xf32> to vector<16x32xf32>
    %95 = arith.subf %85, %94 : vector<16x32xf32>
    %96 = arith.mulf %95, %95 : vector<16x32xf32>
    %cst_47 = arith.constant dense<0.000000e+00> : vector<16xf32>
    %97 = vector.multi_reduction <add>, %96, %cst_47 [1] : vector<16x32xf32> to vector<16xf32>
    %98 = vector.shape_cast %97 : vector<16xf32> to vector<16x1xf32>
    %cst_48 = arith.constant 3.200000e+01 : f32
    %99 = vector.broadcast %cst_48 : f32 to vector<16x1xf32>
    %100 = arith.divf %98, %99 : vector<16x1xf32>
    %101 = vector.broadcast %93 : vector<16x1xf32> to vector<16x32xf32>
    %102 = arith.subf %85, %101 : vector<16x32xf32>
    %cst_49 = arith.constant 9.99999974E-6 : f32
    %103 = vector.broadcast %cst_49 : f32 to vector<16x1xf32>
    %104 = arith.addf %100, %103 : vector<16x1xf32>
    %105 = math.rsqrt %104 : vector<16x1xf32>
    %106 = vector.broadcast %105 : vector<16x1xf32> to vector<16x32xf32>
    %107 = arith.mulf %102, %106 : vector<16x32xf32>
    %108 = vector.broadcast %87 : vector<1x32xf32> to vector<16x32xf32>
    %109 = arith.mulf %107, %108 : vector<16x32xf32>
    %110 = vector.broadcast %89 : vector<1x32xf32> to vector<16x32xf32>
    %111 = arith.addf %109, %110 : vector<16x32xf32>
    %112 = vector.broadcast %7 : vector<16x1xf32> to vector<16x32xf32>
    %113 = arith.mulf %111, %112 : vector<16x32xf32>
    %cst_50 = arith.constant 0.000000e+00 : f32
    %114 = vector.broadcast %cst_50 : f32 to vector<16x64xf32>
    %c0_51 = arith.constant 0 : index
    %c0_52 = arith.constant 0 : index
    %c0_53 = arith.constant 0 : index
    %115 = vector.load %arg12[%c0_51, %c0_52, %c0_53] : memref<1x1x64xf32, #tpu.memory_space<vmem>>, vector<1x1x64xf32>
    %116 = vector.shape_cast %115 : vector<1x1x64xf32> to vector<1x64xf32>
    %117 = vector.broadcast %116 : vector<1x64xf32> to vector<16x64xf32>
    %118 = arith.addf %114, %117 : vector<16x64xf32>
    %c1_i32 = arith.constant 1 : i32
    %119 = tpu.dynamic_rotate %113 by %c1_i32 dim 0 : vector<16x32xf32>, i32 -> vector<16x32xf32>
    %c-1_i32 = arith.constant -1 : i32
    %120 = vector.broadcast %c-1_i32 : i32 to vector<16x1xi32>
    %121 = arith.addi %2, %120 : vector<16x1xi32>
    %c0_i32_54 = arith.constant 0 : i32
    %122 = vector.broadcast %c0_i32_54 : i32 to vector<16x1xi32>
    %123 = arith.cmpi sge, %121, %122 : vector<16x1xi32>
    %c-1_i32_55 = arith.constant -1 : i32
    %124 = vector.broadcast %c-1_i32_55 : i32 to vector<16x1xi32>
    %125 = arith.addi %2, %124 : vector<16x1xi32>
    %c16_i32 = arith.constant 16 : i32
    %126 = vector.broadcast %c16_i32 : i32 to vector<16x1xi32>
    %127 = arith.cmpi slt, %125, %126 : vector<16x1xi32>
    %128 = arith.andi %123, %127 : vector<16x1xi1>
    %cst_56 = arith.constant 0.000000e+00 : f32
    %129 = vector.shape_cast %128 : vector<16x1xi1> to vector<16x1xi1>
    %130 = vector.broadcast %129 : vector<16x1xi1> to vector<16x32xi1>
    %131 = vector.broadcast %cst_56 : f32 to vector<16x32xf32>
    %132 = arith.select %130, %119, %131 : vector<16x32xi1>, vector<16x32xf32>
    %133 = arith.truncf %132 : vector<16x32xf32> to vector<16x32xbf16>
    %c0_57 = arith.constant 0 : index
    %c0_58 = arith.constant 0 : index
    %c0_59 = arith.constant 0 : index
    %c0_60 = arith.constant 0 : index
    %134 = vector.load %arg11[%c0_57, %c0_58, %c0_59, %c0_60] : memref<1x3x32x64xf32, #tpu.memory_space<vmem>>, vector<1x1x32x64xf32>
    %135 = vector.shape_cast %134 : vector<1x1x32x64xf32> to vector<32x64xf32>
    %136 = arith.truncf %135 : vector<32x64xf32> to vector<32x64xbf16>
    %cst_61 = arith.constant dense<0.000000e+00> : vector<16x64xf32>
    %137 = tpu.matmul %133, %136, %cst_61 {dimension_numbers = #tpu.dot_dimension_numbers<[1], [0], [0], [1], [0, 0, 1, 1], [], []>} : vector<16x32xbf16>, vector<32x64xbf16>, vector<16x64xf32> -> vector<16x64xf32>
    %138 = arith.addf %118, %137 : vector<16x64xf32>
    %139 = arith.truncf %113 : vector<16x32xf32> to vector<16x32xbf16>
    %c0_62 = arith.constant 0 : index
    %c1 = arith.constant 1 : index
    %c0_63 = arith.constant 0 : index
    %c0_64 = arith.constant 0 : index
    %140 = vector.load %arg11[%c0_62, %c1, %c0_63, %c0_64] : memref<1x3x32x64xf32, #tpu.memory_space<vmem>>, vector<1x1x32x64xf32>
    %141 = vector.shape_cast %140 : vector<1x1x32x64xf32> to vector<32x64xf32>
    %142 = arith.truncf %141 : vector<32x64xf32> to vector<32x64xbf16>
    %cst_65 = arith.constant dense<0.000000e+00> : vector<16x64xf32>
    %143 = tpu.matmul %139, %142, %cst_65 {dimension_numbers = #tpu.dot_dimension_numbers<[1], [0], [0], [1], [0, 0, 1, 1], [], []>} : vector<16x32xbf16>, vector<32x64xbf16>, vector<16x64xf32> -> vector<16x64xf32>
    %144 = arith.addf %138, %143 : vector<16x64xf32>
    %c15_i32 = arith.constant 15 : i32
    %145 = tpu.dynamic_rotate %113 by %c15_i32 dim 0 : vector<16x32xf32>, i32 -> vector<16x32xf32>
    %c1_i32_66 = arith.constant 1 : i32
    %146 = vector.broadcast %c1_i32_66 : i32 to vector<16x1xi32>
    %147 = arith.addi %2, %146 : vector<16x1xi32>
    %c0_i32_67 = arith.constant 0 : i32
    %148 = vector.broadcast %c0_i32_67 : i32 to vector<16x1xi32>
    %149 = arith.cmpi sge, %147, %148 : vector<16x1xi32>
    %c1_i32_68 = arith.constant 1 : i32
    %150 = vector.broadcast %c1_i32_68 : i32 to vector<16x1xi32>
    %151 = arith.addi %2, %150 : vector<16x1xi32>
    %c16_i32_69 = arith.constant 16 : i32
    %152 = vector.broadcast %c16_i32_69 : i32 to vector<16x1xi32>
    %153 = arith.cmpi slt, %151, %152 : vector<16x1xi32>
    %154 = arith.andi %149, %153 : vector<16x1xi1>
    %cst_70 = arith.constant 0.000000e+00 : f32
    %155 = vector.shape_cast %154 : vector<16x1xi1> to vector<16x1xi1>
    %156 = vector.broadcast %155 : vector<16x1xi1> to vector<16x32xi1>
    %157 = vector.broadcast %cst_70 : f32 to vector<16x32xf32>
    %158 = arith.select %156, %145, %157 : vector<16x32xi1>, vector<16x32xf32>
    %159 = arith.truncf %158 : vector<16x32xf32> to vector<16x32xbf16>
    %c0_71 = arith.constant 0 : index
    %c2 = arith.constant 2 : index
    %c0_72 = arith.constant 0 : index
    %c0_73 = arith.constant 0 : index
    %160 = vector.load %arg11[%c0_71, %c2, %c0_72, %c0_73] : memref<1x3x32x64xf32, #tpu.memory_space<vmem>>, vector<1x1x32x64xf32>
    %161 = vector.shape_cast %160 : vector<1x1x32x64xf32> to vector<32x64xf32>
    %162 = arith.truncf %161 : vector<32x64xf32> to vector<32x64xbf16>
    %cst_74 = arith.constant dense<0.000000e+00> : vector<16x64xf32>
    %163 = tpu.matmul %159, %162, %cst_74 {dimension_numbers = #tpu.dot_dimension_numbers<[1], [0], [0], [1], [0, 0, 1, 1], [], []>} : vector<16x32xbf16>, vector<32x64xbf16>, vector<16x64xf32> -> vector<16x64xf32>
    %164 = arith.addf %144, %163 : vector<16x64xf32>
    %cst_75 = arith.constant 0.000000e+00 : f32
    %165 = vector.broadcast %cst_75 : f32 to vector<16x64xf32>
    %166 = arith.maximumf %164, %165 : vector<16x64xf32>
    %167 = vector.broadcast %7 : vector<16x1xf32> to vector<16x64xf32>
    %168 = arith.mulf %166, %167 : vector<16x64xf32>
    %cst_76 = arith.constant 0.000000e+00 : f32
    %169 = vector.broadcast %cst_76 : f32 to vector<16x32xf32>
    %c0_77 = arith.constant 0 : index
    %c0_78 = arith.constant 0 : index
    %c0_79 = arith.constant 0 : index
    %170 = vector.load %arg14[%c0_77, %c0_78, %c0_79] : memref<1x1x32xf32, #tpu.memory_space<vmem>>, vector<1x1x32xf32>
    %171 = vector.shape_cast %170 : vector<1x1x32xf32> to vector<1x32xf32>
    %172 = vector.broadcast %171 : vector<1x32xf32> to vector<16x32xf32>
    %173 = arith.addf %169, %172 : vector<16x32xf32>
    %c1_i32_80 = arith.constant 1 : i32
    %174 = tpu.dynamic_rotate %168 by %c1_i32_80 dim 0 : vector<16x64xf32>, i32 -> vector<16x64xf32>
    %c-1_i32_81 = arith.constant -1 : i32
    %175 = vector.broadcast %c-1_i32_81 : i32 to vector<16x1xi32>
    %176 = arith.addi %2, %175 : vector<16x1xi32>
    %c0_i32_82 = arith.constant 0 : i32
    %177 = vector.broadcast %c0_i32_82 : i32 to vector<16x1xi32>
    %178 = arith.cmpi sge, %176, %177 : vector<16x1xi32>
    %c-1_i32_83 = arith.constant -1 : i32
    %179 = vector.broadcast %c-1_i32_83 : i32 to vector<16x1xi32>
    %180 = arith.addi %2, %179 : vector<16x1xi32>
    %c16_i32_84 = arith.constant 16 : i32
    %181 = vector.broadcast %c16_i32_84 : i32 to vector<16x1xi32>
    %182 = arith.cmpi slt, %180, %181 : vector<16x1xi32>
    %183 = arith.andi %178, %182 : vector<16x1xi1>
    %cst_85 = arith.constant 0.000000e+00 : f32
    %184 = vector.shape_cast %183 : vector<16x1xi1> to vector<16x1xi1>
    %185 = vector.broadcast %184 : vector<16x1xi1> to vector<16x64xi1>
    %186 = vector.broadcast %cst_85 : f32 to vector<16x64xf32>
    %187 = arith.select %185, %174, %186 : vector<16x64xi1>, vector<16x64xf32>
    %188 = arith.truncf %187 : vector<16x64xf32> to vector<16x64xbf16>
    %c0_86 = arith.constant 0 : index
    %c0_87 = arith.constant 0 : index
    %c0_88 = arith.constant 0 : index
    %c0_89 = arith.constant 0 : index
    %189 = vector.load %arg13[%c0_86, %c0_87, %c0_88, %c0_89] : memref<1x3x64x32xf32, #tpu.memory_space<vmem>>, vector<1x1x64x32xf32>
    %190 = vector.shape_cast %189 : vector<1x1x64x32xf32> to vector<64x32xf32>
    %191 = arith.truncf %190 : vector<64x32xf32> to vector<64x32xbf16>
    %cst_90 = arith.constant dense<0.000000e+00> : vector<16x32xf32>
    %192 = tpu.matmul %188, %191, %cst_90 {dimension_numbers = #tpu.dot_dimension_numbers<[1], [0], [0], [1], [0, 0, 1, 1], [], []>} : vector<16x64xbf16>, vector<64x32xbf16>, vector<16x32xf32> -> vector<16x32xf32>
    %193 = arith.addf %173, %192 : vector<16x32xf32>
    %194 = arith.truncf %168 : vector<16x64xf32> to vector<16x64xbf16>
    %c0_91 = arith.constant 0 : index
    %c1_92 = arith.constant 1 : index
    %c0_93 = arith.constant 0 : index
    %c0_94 = arith.constant 0 : index
    %195 = vector.load %arg13[%c0_91, %c1_92, %c0_93, %c0_94] : memref<1x3x64x32xf32, #tpu.memory_space<vmem>>, vector<1x1x64x32xf32>
    %196 = vector.shape_cast %195 : vector<1x1x64x32xf32> to vector<64x32xf32>
    %197 = arith.truncf %196 : vector<64x32xf32> to vector<64x32xbf16>
    %cst_95 = arith.constant dense<0.000000e+00> : vector<16x32xf32>
    %198 = tpu.matmul %194, %197, %cst_95 {dimension_numbers = #tpu.dot_dimension_numbers<[1], [0], [0], [1], [0, 0, 1, 1], [], []>} : vector<16x64xbf16>, vector<64x32xbf16>, vector<16x32xf32> -> vector<16x32xf32>
    %199 = arith.addf %193, %198 : vector<16x32xf32>
    %c15_i32_96 = arith.constant 15 : i32
    %200 = tpu.dynamic_rotate %168 by %c15_i32_96 dim 0 : vector<16x64xf32>, i32 -> vector<16x64xf32>
    %c1_i32_97 = arith.constant 1 : i32
    %201 = vector.broadcast %c1_i32_97 : i32 to vector<16x1xi32>
    %202 = arith.addi %2, %201 : vector<16x1xi32>
    %c0_i32_98 = arith.constant 0 : i32
    %203 = vector.broadcast %c0_i32_98 : i32 to vector<16x1xi32>
    %204 = arith.cmpi sge, %202, %203 : vector<16x1xi32>
    %c1_i32_99 = arith.constant 1 : i32
    %205 = vector.broadcast %c1_i32_99 : i32 to vector<16x1xi32>
    %206 = arith.addi %2, %205 : vector<16x1xi32>
    %c16_i32_100 = arith.constant 16 : i32
    %207 = vector.broadcast %c16_i32_100 : i32 to vector<16x1xi32>
    %208 = arith.cmpi slt, %206, %207 : vector<16x1xi32>
    %209 = arith.andi %204, %208 : vector<16x1xi1>
    %cst_101 = arith.constant 0.000000e+00 : f32
    %210 = vector.shape_cast %209 : vector<16x1xi1> to vector<16x1xi1>
    %211 = vector.broadcast %210 : vector<16x1xi1> to vector<16x64xi1>
    %212 = vector.broadcast %cst_101 : f32 to vector<16x64xf32>
    %213 = arith.select %211, %200, %212 : vector<16x64xi1>, vector<16x64xf32>
    %214 = arith.truncf %213 : vector<16x64xf32> to vector<16x64xbf16>
    %c0_102 = arith.constant 0 : index
    %c2_103 = arith.constant 2 : index
    %c0_104 = arith.constant 0 : index
    %c0_105 = arith.constant 0 : index
    %215 = vector.load %arg13[%c0_102, %c2_103, %c0_104, %c0_105] : memref<1x3x64x32xf32, #tpu.memory_space<vmem>>, vector<1x1x64x32xf32>
    %216 = vector.shape_cast %215 : vector<1x1x64x32xf32> to vector<64x32xf32>
    %217 = arith.truncf %216 : vector<64x32xf32> to vector<64x32xbf16>
    %cst_106 = arith.constant dense<0.000000e+00> : vector<16x32xf32>
    %218 = tpu.matmul %214, %217, %cst_106 {dimension_numbers = #tpu.dot_dimension_numbers<[1], [0], [0], [1], [0, 0, 1, 1], [], []>} : vector<16x64xbf16>, vector<64x32xbf16>, vector<16x32xf32> -> vector<16x32xf32>
    %219 = arith.addf %199, %218 : vector<16x32xf32>
    %220 = vector.broadcast %7 : vector<16x1xf32> to vector<16x32xf32>
    %221 = arith.mulf %219, %220 : vector<16x32xf32>
    %222 = arith.addf %111, %221 : vector<16x32xf32>
    %c0_107 = arith.constant 0 : index
    %c0_108 = arith.constant 0 : index
    %c0_109 = arith.constant 0 : index
    %223 = vector.load %arg15[%c0_107, %c0_108, %c0_109] : memref<1x1x32xf32, #tpu.memory_space<vmem>>, vector<1x1x32xf32>
    %224 = vector.shape_cast %223 : vector<1x1x32xf32> to vector<1x32xf32>
    %c0_110 = arith.constant 0 : index
    %c0_111 = arith.constant 0 : index
    %c0_112 = arith.constant 0 : index
    %225 = vector.load %arg16[%c0_110, %c0_111, %c0_112] : memref<1x1x32xf32, #tpu.memory_space<vmem>>, vector<1x1x32xf32>
    %226 = vector.shape_cast %225 : vector<1x1x32xf32> to vector<1x32xf32>
    %cst_113 = arith.constant dense<0.000000e+00> : vector<16xf32>
    %227 = vector.multi_reduction <add>, %222, %cst_113 [1] : vector<16x32xf32> to vector<16xf32>
    %228 = vector.shape_cast %227 : vector<16xf32> to vector<16x1xf32>
    %cst_114 = arith.constant 3.200000e+01 : f32
    %229 = vector.broadcast %cst_114 : f32 to vector<16x1xf32>
    %230 = arith.divf %228, %229 : vector<16x1xf32>
    %231 = vector.broadcast %230 : vector<16x1xf32> to vector<16x32xf32>
    %232 = arith.subf %222, %231 : vector<16x32xf32>
    %233 = arith.mulf %232, %232 : vector<16x32xf32>
    %cst_115 = arith.constant dense<0.000000e+00> : vector<16xf32>
    %234 = vector.multi_reduction <add>, %233, %cst_115 [1] : vector<16x32xf32> to vector<16xf32>
    %235 = vector.shape_cast %234 : vector<16xf32> to vector<16x1xf32>
    %cst_116 = arith.constant 3.200000e+01 : f32
    %236 = vector.broadcast %cst_116 : f32 to vector<16x1xf32>
    %237 = arith.divf %235, %236 : vector<16x1xf32>
    %238 = vector.broadcast %230 : vector<16x1xf32> to vector<16x32xf32>
    %239 = arith.subf %222, %238 : vector<16x32xf32>
    %cst_117 = arith.constant 9.99999974E-6 : f32
    %240 = vector.broadcast %cst_117 : f32 to vector<16x1xf32>
    %241 = arith.addf %237, %240 : vector<16x1xf32>
    %242 = math.rsqrt %241 : vector<16x1xf32>
    %243 = vector.broadcast %242 : vector<16x1xf32> to vector<16x32xf32>
    %244 = arith.mulf %239, %243 : vector<16x32xf32>
    %245 = vector.broadcast %224 : vector<1x32xf32> to vector<16x32xf32>
    %246 = arith.mulf %244, %245 : vector<16x32xf32>
    %247 = vector.broadcast %226 : vector<1x32xf32> to vector<16x32xf32>
    %248 = arith.addf %246, %247 : vector<16x32xf32>
    %c1_i32_118 = arith.constant 1 : i32
    %249 = arith.cmpi eq, %arg1, %c1_i32_118 : i32
    %250 = vector.broadcast %7 : vector<16x1xf32> to vector<16x32xf32>
    %251 = arith.mulf %248, %250 : vector<16x32xf32>
    %252 = arith.select %249, %251, %248 : vector<16x32xf32>
    %253 = vector.shape_cast %252 : vector<16x32xf32> to vector<1x16x32xf32>
    %c0_119 = arith.constant 0 : index
    %c0_120 = arith.constant 0 : index
    %c0_121 = arith.constant 0 : index
    %254 = vector.load %arg17[%c0_119, %c0_120, %c0_121] : memref<1x16x32xf32, #tpu.memory_space<vmem>>, vector<1x16x32xf32>
    tpu.vector_store %arg17[%c0_119, %c0_120, %c0_121], %253 {strides = array<i32>} : memref<1x16x32xf32, #tpu.memory_space<vmem>>, vector<1x16x32xf32>,
    return
  }
  func.func @transform_0(%arg0: i32, %arg1: i32, %arg2: memref<2xi32, #tpu.memory_space<smem>>) -> (i32, i32, i32) {
    %c0_i32 = arith.constant 0 : i32
    %c0_i32_0 = arith.constant 0 : i32
    %c0_i32_1 = arith.constant 0 : i32
    return %arg0, %c0_i32, %c0_i32_0 : i32, i32, i32
  }
  func.func @transform_1(%arg0: i32, %arg1: i32, %arg2: memref<2xi32, #tpu.memory_space<smem>>) -> (i32, i32, i32) {
    %c0_i32 = arith.constant 0 : i32
    %c0_i32_0 = arith.constant 0 : i32
    %c0_i32_1 = arith.constant 0 : i32
    return %arg0, %c0_i32, %c0_i32_0 : i32, i32, i32
  }
  func.func @transform_2(%arg0: i32, %arg1: i32, %arg2: memref<2xi32, #tpu.memory_space<smem>>) -> (i32, i32, i32) {
    %c0_i32 = arith.constant 0 : i32
    %c0_i32_0 = arith.constant 0 : i32
    %c0_i32_1 = arith.constant 0 : i32
    return %arg1, %c0_i32, %c0_i32_0 : i32, i32, i32
  }
  func.func @transform_3(%arg0: i32, %arg1: i32, %arg2: memref<2xi32, #tpu.memory_space<smem>>) -> (i32, i32, i32) {
    %c0_i32 = arith.constant 0 : i32
    %c0_i32_0 = arith.constant 0 : i32
    %c0_i32_1 = arith.constant 0 : i32
    return %arg1, %c0_i32, %c0_i32_0 : i32, i32, i32
  }
  func.func @transform_4(%arg0: i32, %arg1: i32, %arg2: memref<2xi32, #tpu.memory_space<smem>>) -> (i32, i32, i32) {
    %c0_i32 = arith.constant 0 : i32
    %c0_i32_0 = arith.constant 0 : i32
    %c0_i32_1 = arith.constant 0 : i32
    return %arg1, %c0_i32, %c0_i32_0 : i32, i32, i32
  }
  func.func @transform_5(%arg0: i32, %arg1: i32, %arg2: memref<2xi32, #tpu.memory_space<smem>>) -> (i32, i32, i32) {
    %c0_i32 = arith.constant 0 : i32
    %c0_i32_0 = arith.constant 0 : i32
    %c0_i32_1 = arith.constant 0 : i32
    return %arg1, %c0_i32, %c0_i32_0 : i32, i32, i32
  }
  func.func @transform_6(%arg0: i32, %arg1: i32, %arg2: memref<2xi32, #tpu.memory_space<smem>>) -> (i32, i32, i32) {
    %c0_i32 = arith.constant 0 : i32
    %c0_i32_0 = arith.constant 0 : i32
    %c0_i32_1 = arith.constant 0 : i32
    return %arg1, %c0_i32, %c0_i32_0 : i32, i32, i32
  }
  func.func @transform_7(%arg0: i32, %arg1: i32, %arg2: memref<2xi32, #tpu.memory_space<smem>>) -> (i32, i32, i32) {
    %c0_i32 = arith.constant 0 : i32
    %c0_i32_0 = arith.constant 0 : i32
    %c0_i32_1 = arith.constant 0 : i32
    return %arg1, %c0_i32, %c0_i32_0 : i32, i32, i32
  }
  func.func @transform_8(%arg0: i32, %arg1: i32, %arg2: memref<2xi32, #tpu.memory_space<smem>>) -> (i32, i32, i32, i32) {
    %c0_i32 = arith.constant 0 : i32
    %c0_i32_0 = arith.constant 0 : i32
    %c0_i32_1 = arith.constant 0 : i32
    %c0_i32_2 = arith.constant 0 : i32
    return %arg1, %c0_i32, %c0_i32_0, %c0_i32_1 : i32, i32, i32, i32
  }
  func.func @transform_9(%arg0: i32, %arg1: i32, %arg2: memref<2xi32, #tpu.memory_space<smem>>) -> (i32, i32, i32) {
    %c0_i32 = arith.constant 0 : i32
    %c0_i32_0 = arith.constant 0 : i32
    %c0_i32_1 = arith.constant 0 : i32
    return %arg1, %c0_i32, %c0_i32_0 : i32, i32, i32
  }
  func.func @transform_10(%arg0: i32, %arg1: i32, %arg2: memref<2xi32, #tpu.memory_space<smem>>) -> (i32, i32, i32, i32) {
    %c0_i32 = arith.constant 0 : i32
    %c0_i32_0 = arith.constant 0 : i32
    %c0_i32_1 = arith.constant 0 : i32
    %c0_i32_2 = arith.constant 0 : i32
    return %arg1, %c0_i32, %c0_i32_0, %c0_i32_1 : i32, i32, i32, i32
  }
  func.func @transform_11(%arg0: i32, %arg1: i32, %arg2: memref<2xi32, #tpu.memory_space<smem>>) -> (i32, i32, i32) {
    %c0_i32 = arith.constant 0 : i32
    %c0_i32_0 = arith.constant 0 : i32
    %c0_i32_1 = arith.constant 0 : i32
    return %arg1, %c0_i32, %c0_i32_0 : i32, i32, i32
  }
  func.func @transform_12(%arg0: i32, %arg1: i32, %arg2: memref<2xi32, #tpu.memory_space<smem>>) -> (i32, i32, i32) {
    %c0_i32 = arith.constant 0 : i32
    %c0_i32_0 = arith.constant 0 : i32
    %c0_i32_1 = arith.constant 0 : i32
    return %arg1, %c0_i32, %c0_i32_0 : i32, i32, i32
  }
  func.func @transform_13(%arg0: i32, %arg1: i32, %arg2: memref<2xi32, #tpu.memory_space<smem>>) -> (i32, i32, i32) {
    %c0_i32 = arith.constant 0 : i32
    %c0_i32_0 = arith.constant 0 : i32
    %c0_i32_1 = arith.constant 0 : i32
    return %arg1, %c0_i32, %c0_i32_0 : i32, i32, i32
  }
  func.func @transform_14(%arg0: i32, %arg1: i32, %arg2: memref<2xi32, #tpu.memory_space<smem>>) -> (i32, i32, i32) {
    %c0_i32 = arith.constant 0 : i32
    %c0_i32_0 = arith.constant 0 : i32
    %c0_i32_1 = arith.constant 0 : i32
    return %arg0, %c0_i32, %c0_i32_0 : i32, i32, i32
  }
}

</mosaic_0001>

<bundles_post_ra>
// kernel: tpu_custom_call.1
= control target key start
LH: loop header
LB: loop body
LE: loop exit
PB: predicated region body
PF: predicated region fallthrough
CT: control target
= control target key end

     0   :  { %s2928_s0 = inlined_call_operand.vmem [shape: s32[2], index: 0, kind: input, shape index: {}]   ;;  %s2929_s1 = inlined_call_operand.vmem [shape: f32[2,16,32], index: 1, kind: input, shape index: {}]   ;;  %s2930_s2 = inlined_call_operand.vmem [shape: f32[2,1,32], index: 2, kind: input, shape index: {}]   ;;  %s2931_s3 = inlined_call_operand.vmem [shape: f32[2,32,96], index: 3, kind: input, shape index: {}]   ;;  %s2932_s4 = inlined_call_operand.vmem [shape: f32[2,1,96], index: 4, kind: input, shape index: {}]   ;;  %s2933_s5 = inlined_call_operand.vmem [shape: f32[2,32,32], index: 5, kind: input, shape index: {}]   ;;  %s2934_s6 = inlined_call_operand.vmem [shape: f32[2,1,32], index: 6, kind: input, shape index: {}]   ;;  %s2935_s7 = inlined_call_operand.vmem [shape: f32[2,1,32], index: 7, kind: input, shape index: {}]   ;;  %s2936_s8 = inlined_call_operand.vmem [shape: f32[2,1,32], index: 8, kind: input, shape index: {}]   ;;  %s2937_s9 = inlined_call_operand.vmem [shape: f32[2,3,32,64], index: 9, kind: input, shape index: {}]   ;;  %s2938_s10 = inlined_call_operand.vmem [shape: f32[2,1,64], index: 10, kind: input, shape index: {}]   ;;  %s2939_s11 = inlined_call_operand.vmem [shape: f32[2,3,64,32], index: 11, kind: input, shape index: {}]   ;;  %s2940_s12 = inlined_call_operand.vmem [shape: f32[2,1,32], index: 12, kind: input, shape index: {}]   ;;  %s2941_s13 = inlined_call_operand.vmem [shape: f32[2,1,32], index: 13, kind: input, shape index: {}]   ;;  %s2942_s14 = inlined_call_operand.vmem [shape: f32[2,1,32], index: 14, kind: input, shape index: {}]   ;;  %s2943_s15 = inlined_call_operand.hbm [shape: f32[2,16,32], index: 15, kind: output, shape index: {}]  }
   0x1   :  { %2959 = sst [smem:[#allocation22_spill]] %s2929_s1  ;;  %s20_s20 = sshll.u32 %s2928_s0, 4  ;;  %s21_s20 = int_to_ptr.vmem [resolvable:$true] %s20_s20 }
   0x2   :  { %2960 = sst [smem:[#allocation23_spill]] %s2930_s2  ;;  %s2229_s21 = scalar_lea.vmem %s21_s20, 16 }
   0x3   :  { %2961 = sst [smem:[#allocation24_spill]] %s2931_s3  ;;  %p2230_p0 = scmp.ne.s32.totalorder %s21_s20, %s2229_s21 }
   0x4   :  { %2962 = sst [smem:[#allocation25_spill]] %s2933_s5  ;;  %p2234_p1 = scmp.lt.s32.totalorder %s21_s20, %s21_s20 }
   0x5   :  { %2963 = sst [smem:[#allocation26_spill]] %s2943_s15  ;;  %p2235_p2 = scmp.lt.s32.totalorder %s2229_s21, %s2229_s21 }
   0x7   :  { %p2236_p3 = por %p2235_p2, %p2234_p1 }
   0x9   :  { %p2237_p4 = pnand %p2236_p3, %p2230_p0 }
   0xb   :  { %2240 = shalt.err (!%p2237_p4)  }
   0xc   :  { %s2339_s22 = smov [#allocation4]  }
   0xd   :  { %23 = dma.vmem_to_smem %s21_s20, 16, %s2339_s22, [#allocation3] }
   0xe   :  { %2301 = dma.done.wait [#allocation3], 16 }
   0xf   :  { %2302 = vsyncadd [#allocation3], 4294967280 }
  0x10   :  { %25 = sfence }
  0x11   :  { %26 = vsyncpa [#allocation6], 0 }
  0x12   :  { %28 = vsyncpa [#allocation6 + $0x1], 0  ;;  %s2433_s23 = smov 0   ;;  %s2435_s24 = smov 0  }
  0x13   :  { %s2437_s0 = smov 0   ;;  %s2439_s25 = smov 0  }
  0x14   :  { %s2441_s26 = smov 0   ;;  %s2443_s27 = smov 0  }
  0x15   :  { %s2445_s28 = smov 0   ;;  %s2447_s29 = smov 0  }
  0x16 LB: > { %2964 = sst [smem:[#allocation9_spill]] %s2309_s23  ;;  %s1889_s30 = sadd.s32 4294967295, %s2337_s29   ;;  %s2337_s29 = sphi %s2447_s29, %s34_s29   ;;  %s2333_s28 = sphi %s2445_s28, %s3011_s28   ;;  %s2329_s27 = sphi %s2443_s27, %s3010_s27   ;;  %s2325_s26 = sphi %s2441_s26, %s3009_s26   ;;  %s2321_s25 = sphi %s2439_s25, %s3008_s25   ;;  %s2317_s0 = sphi %s2437_s0, %s3007_s0   ;;  %s2313_s24 = sphi %s2435_s24, %s3006_s24   ;;  %s2309_s23 = sphi %s2433_s23, %s3005_s23  }
  0x17   : > { %2965 = sst [smem:[#allocation10_spill]] %s2313_s24  ;;  %s1890_s16 = sadd.s32 4294967294, %s2337_s29  }
  0x18   : > { %2966 = sst [smem:[#allocation11_spill]] %s2317_s0  ;;  %s43_s17 = sadd.s32 1, %s2329_s27 }
  0x19   : > { %2967 = sst [smem:[#allocation12_spill]] %s2325_s26  ;;  %p44_p5 = scmp.ge.s32.totalorder %s43_s17, 2 }
  0x1a   : > { %2968 = sst [smem:[#allocation13_spill]] %s2329_s27  ;;  %s46_s18 = sadd.s32 1, %s2333_s28 }
  0x1b   : > { %2969 = sst [smem:[#allocation14_spill]] %s2333_s28  ;;  %p427_p6 = scmp.ne.s32.totalorder %s2317_s0, %s2313_s24 }
  0x1c   : > { %2970 = sst [smem:[#allocation15_spill]] %s2337_s29  ;;  %p428_p7 = scmp.eq.s32.totalorder %s1889_s30, 3 }
  0x1d   : > { %s3013_s17 = smov (%p44_p5, %s43_s17), 0  ;;  %s3015_s18 = smov (!%p44_p5, %s46_s18), %s2333_s28 }
  0x1e   : > { %2971 = sst [smem:[#allocation16_spill]] %s3013_s17  ;;  %p2482_p8 = por %p428_p7, %p427_p6 }
  0x1f   : > { %p433_p9 = scmp.ne.s32.totalorder %s2313_s24, %s2309_s23  ;;  %p48_p10 = scmp.ge.s32.totalorder %s3015_s18, 2 }
  0x20   : > { %s2972_s19 = scalar_select %p2482_p8, 1, 0 }
  0x21   : > { %p434_p11 = scmp.eq.s32.totalorder %s1890_s16, 3  ;;  %p1893_p12 = scmp.ge.s32.totalorder %s2337_s29, 1 }
  0x22   : > { %2973 = sst [smem:[#allocation17_spill]] %s2972_s19  ;;  %p546_p13 = scmp.lt.s32.totalorder %s2337_s29, 5 }
  0x23   : > { %s3017_s18 = smov (%p48_p10, %s3015_s18), 0  ;;  %p2492_p0 = por %p434_p11, %p433_p9 }
  0x24   : > { %2974 = sst [smem:[#allocation18_spill]] %s3017_s18  ;;  %p547_p1 = pnand %p1893_p12, %p546_p13 }
  0x25   : > { %s2975_s20 = scalar_select %p2492_p0, 1, 0 }
  0x26   : > { %s414_s21 = ssub.s32 %s2333_s28, %s3017_s18  ;;  %s417_s22 = sadd.s32 1, %s2317_s0 }
  0x27   : > { %2976 = sst [smem:[#allocation19_spill]] %s2975_s20  ;;  %p415_p2 = scmp.eq.s32.totalorder %s414_s21, 0 }
  0x28   : > { %550 = sbr.rel (%p547_p1) target bundleno = 3085 (0xc0d), region = 76 }
  0x29   : > { %s2500_s30 = scalar_select %p415_p2, %s2317_s0, %s417_s22  }
  0x2b   : > { %2977 = sst [smem:[#allocation20_spill]] %s2500_s30 }
  0x2f   : > { %s2947_s16 = sand.u32 1, %s2313_s24   ;;  %p639_p3 = scmp.lt.s32.totalorder %s2325_s26, 1  ;;  %v693_v0 = vlaneseq  ;;  %v2340_v5 = vmov 0.0  }
  0x30   : > { %s2506_s17 = sshll.u32 %s2947_s16, 4  ;;  %p647_p4 = scmp.lt.s32.totalorder %s2321_s25, 1 }
  0x31   : > { %s692_s18 = sld [smem:[#allocation4 + %s2325_s26]]  ;;  %v2510_v1 = vshrl.u32 %v693_v0, 7  ;;  %v697_v3 = vand.u32 127, %v693_v0  ;;  %p1905_p5 = scmp.ne.s32.totalorder %s2321_s25, 0 }
  0x32   : > { %s2513_s21 = scalar_select %p639_p3, %s2325_s26, 1 }
  0x33   : > { %s2516_s22 = scalar_select %p647_p4, %s2321_s25, 1  ;;  %v2524_v2 = vadd.s32 8, %v2510_v1 }
  0x34   : > { %2978 = sst [smem:[#allocation21_spill]] %s2513_s21  ;;  %s1957_s28 = sshll.u32 %s2513_s21, 4  ;;  %vm729_vm5 = vcmask (!%p1905_p5), 261120  }
  0x35   : > { %s2980_s1 = sld [smem:[#allocation22_spill]]  ;;  %s1958_s29 = sshll.u32 %s2516_s22, 5 }
  0x36   : > { %s2981_s3 = sld [smem:[#allocation24_spill]]  ;;  %s2982_s5 = sld [smem:[#allocation25_spill]] }
  0x37   : > { %v698_v4 = vstv %s692_s18  ;;  %s2122_s2 = smul.u32 96, %s2516_s22  ;;  %s687_s27 = scalar_lea.vmem %s2941_s13, %s2516_s22 }
  0x38   : > { %vm699_vm0 = vcmp.lt.s32.totalorder %v2510_v1, %v698_v4  ;;  %vm700_vm1 = vcmp.lt.s32.totalorder %v2524_v2, %v698_v4  ;;  %vm705_vm2 = vcmp.lt.s32.totalorder %v697_v3, %v698_v4  ;;  %715 = sbr.rel (%p1905_p5) target bundleno = 76 (0x4c), region = 80  ;;  %s2988_s20 = sld [smem:[#allocation23_spill]] (!%p1905_p5) }
  0x39   : > { %v2566_v6 = vsel %vm699_vm0, 1.0, %v2340_v5  ;;  %v2569_v7 = vsel %vm700_vm1, 1.0, %v2340_v5  ;;  %vm2571_vm3 = vmand %vm699_vm0, %vm705_vm2 }
  0x3a   : > { %vm2580_vm4 = vmand %vm700_vm1, %vm705_vm2 }
  0x3b   : > { %s2529_s23 = scalar_lea.vmem %s2980_s1, %s1957_s28  ;;  %s2123_s1 = smul.u32 192, %s2516_s22 }
  0x3c   : > { %s2535_s24 = scalar_lea.vmem %s2981_s3, %s1958_s29  ;;  %s2544_s21 = scalar_lea.vmem %s2982_s5, %s1958_s29  ;;  %v716_v10 = vld [vmem:[%s2529_s23] sm:$0xff] (!%p1905_p5)  ;;  %v717_v12 = vld [vmem:[%s2529_s23 + $0x8] sm:$0xff] (!%p1905_p5) }
  0x3d   : > { %s2587_s29 = scalar_lea.vmem %s2937_s9, %s2122_s2  ;;  %s2596_s30 = scalar_lea.vmem %s2939_s11, %s2123_s1 }
  0x3e   : > { %s690_s28 = scalar_lea.vmem %s2942_s14, %s2516_s22  ;;  %s2603_s5 = scalar_lea.vmem [#allocation5], %s2506_s17 }
  0x3f   : > { %s2987_s2 = sld [smem:[#allocation21_spill]] }
  0x45   : > { %s2989_s19 = scalar_lea.vmem %s2988_s20, %s2987_s2 }
  0x46   : > { %v1906_v11 = vld [vmem:[%s2989_s19] ss:$0 sm:$0xff] }
  0x47   : > { %v725_v13 = vadd.f32 %v1906_v11, %v716_v10  ;;  %v726_v14 = vadd.f32 %v1906_v11, %v717_v12 }
  0x49   : > { %v727_v15 = vmul.f32 %v2566_v6, %v725_v13  ;;  %v728_v16 = vmul.f32 %v2569_v7, %v726_v14 }
  0x4b   : > { %730 = vst.msk [vmem:[%s2603_s5] sm:$0xff] %vm729_vm5, %v727_v15  ;;  %731 = vst.msk [vmem:[%s2603_s5 + $0x8] sm:$0xff] %vm729_vm5, %v728_v16 }
  0x4c PF: > { %2000 = vmatprep.subr.bf16.mxu0 %v2340_v5  ;;  %v735_v17 = vld [vmem:[%s2535_s24] sm:$0xff]  ;;  %v736_v18 = vld [vmem:[%s2535_s24 + $0x8] sm:$0xff]  ;;  %v737_v19 = vld [vmem:[%s2535_s24 + $0x10] sm:$0xff]  ;;  %2008 = vmatprep.subr.bf16.mxu1 %v2340_v5  ;;  %vm2341_vm6 = vmmov 0   ;;  %vm748_vm7 = vcmask 261120   ;;  %s2990_s17 = scalar_lea.vmem %s2932_s4, %s2516_s22  ;;  %vm794_vm8 = vcmask 785408   ;;  %s2991_s18 = scalar_lea.vmem %s2934_s6, %s2516_s22 }
  0x4d   : > { %v739_v20 = vpack.c.bf16 %v736_v18, %v735_v17  ;;  %v738_v21 = vld [vmem:[%s2535_s24 + $0x18] sm:$0xff]  ;;  %2004 = vmatprep.mubr.msk.bf16.mxu0 %vm2341_vm6, %v2340_v5  ;;  %2010 = vmatprep.mubr.msk.bf16.mxu1 %vm2341_vm6, %v2340_v5  ;;  %v1907_v26 = vld [vmem:[%s2990_s17] ss:$0 sm:$0xff]  ;;  %s2342_s1 = smov 96   ;;  %vm814_vm9 = vcmask 130048   ;;  %s2343_s26 = smov 64  }
  0x4e   : > { %v740_v22 = vpack.c.bf16 %v738_v21, %v737_v19  ;;  %s2344_s16 = smov 80   ;;  %s2345_s3 = smov 112   ;;  %v796_v11 = vld [vmem:[%s2544_s21] sm:$0xff]  ;;  %v797_v12 = vld [vmem:[%s2544_s21 + $0x8] sm:$0xff]  ;;  %vm1214_vm10 = vcmp.lt.s32.totalorder %v2510_v1, 1  ;;  %vm1340_vm12 = vcmp.lt.s32.totalorder %v2510_v1, 7 }
  0x4f   : > { %2001 = vmatpush3.bf16.msra.mxu0 %v739_v20  ;;  %v800_v13 = vpack.c.bf16 %v797_v12, %v796_v11  ;;  %s2346_s0 = smov 48   ;;  %s2992_s19 = scalar_lea.vmem %s2935_s7, %s2516_s22  ;;  %vm1442_vm14 = vcmask 523264  }
  0x50   : > { %2002 = vmatprep.subr.bf16.mxu0 %v2340_v5  ;;  %s2993_s17 = scalar_lea.vmem %s2936_s8, %s2516_s22  ;;  %p1663_p6 = scmp.eq.s32.totalorder %s2321_s25, 1 }
  0x51   : > { %s2999_s24 = sld [smem:[#allocation26_spill]] }
  0x52   : > { %v2628_v23 = vld [vmem:[%s2603_s5] sm:$0xff]  ;;  %v2631_v24 = vld [vmem:[%s2603_s5 + $0x8] sm:$0xff] }
  0x53   : > { %v734_v25 = vpack.c.bf16 %v2631_v24, %v2628_v23  ;;  %2003 = vmatpush3.bf16.msra.mxu0 %v740_v22 }
  0x54   : > { %2014 = vmatprep.subr.bf16.mxu0 %v2340_v5 }
  0x56   : > { %2005 = vmatmul.mubr.msk.bf16.vlgmr.msra.gmra.mrb[0].mxu0 %vm748_vm7, %v734_v25 }
  0x57   : > { %2016 = vmatprep.mubr.msk.bf16.mxu0 %vm2341_vm6, %v2340_v5 }
 0x129   : > { %v786_v27 = vpop.f32.mrb[0].mxu0 }
 0x12a   : > { %v2006_v28 = vpop.f32.mrb[1].mxu0  ;;  %v787_v30 = vadd.f32 %v1907_v26, %v786_v27 }
 0x12b   : > { %v789_v29 = vpop.f32.mrb[2].mxu0 }
 0x12c   : > { %v790_v31 = vadd.f32 %v1907_v26, %v789_v29  ;;  %v2007_v32 = vpop.f32.mrb[3].mxu0 }
 0x12e   : > { %v793_v33 = vpack.c.bf16 %v790_v31, %v787_v30 }
 0x130   : > { %795 = vst.msk [vmem:[#allocation2] sm:$0xff] %vm794_vm8, %v793_v33 }
 0x137   : > { %v2645_v34 = vld [vmem:[#allocation2] sm:$0xff] }
 0x138   : > { %812 = vrot.lane.b32.xlu0 %v2645_v34, %s2342_s1 }
 0x1aa   : > { %v813_v35 = vpop.permute.xlu0 %812 }
 0x1ab   : > { %v819_v36 = vsel %vm814_vm9, %v813_v35, 0 }
 0x1ac   : > { %2009 = vmatpush3.bf16.xpose.msra.mxu1 %v819_v36 }
 0x1ad   : > { %2020 = vmatprep.subr.bf16.mxu1 %v2340_v5 }
 0x1b3   : > { %2011 = vmatmul.mubr.msk.bf16.vlgmr.msra.gmra.mrb[0].mxu1 %vm814_vm9, %v2645_v34 }
 0x1b4   : > { %2022 = vmatprep.mubr.msk.bf16.mxu1 %vm2341_vm6, %v2340_v5  ;;  %2021 = vmatpush3.bf16.msra.mxu1 %v800_v13 }
 0x1b5   : > { %2032 = vmatprep.subr.bf16.mxu1 %v2340_v5 }
 0x286   : > { %v855_v37 = vpop.f32.mrb[0].mxu1 }
 0x287   : > { %v862_v38 = vmul.f32 0.25, %v855_v37  ;;  %v2012_v39 = vpop.f32.mrb[1].mxu1 }
 0x288   : > { %v858_v40 = vpop.f32.mrb[2].mxu1 }
 0x289   : > { %v864_v41 = vsel %vm2571_vm3, %v862_v38, -10000.0  ;;  %v863_v42 = vmul.f32 0.25, %v858_v40  ;;  %v2013_v43 = vpop.f32.mrb[3].mxu1  ;;  %v798_v40 = vld [vmem:[%s2544_s21 + $0x10] sm:$0xff] }
 0x28a   : > { %v866_v44 = vsel %vm814_vm9, %v864_v41, -inf }
 0x28b   : > { %867 = vmax.xlane.f32.xlu0 %v866_v44  ;;  %v865_v45 = vsel %vm2580_vm4, %v863_v42, -10000.0 }
 0x28c   : > { %v869_v46 = vsel %vm814_vm9, %v865_v45, -inf }
 0x28d   : > { %870 = vmax.xlane.f32.xlu1 %v869_v46 }
 0x29e   : > { %889 = vrot.lane.b32.xlu1 %v2645_v34, %s2343_s26  ;;  %s2994_s26 = scalar_lea.vmem %s2938_s10, %s2516_s22 }
 0x318   : > { %v868_v47 = vpop.xlane.xlu0 %867 }
 0x319   : > { %v872_v48 = vsub.f32 %v864_v41, %v868_v47  ;;  %v799_v41 = vld [vmem:[%s2544_s21 + $0x18] sm:$0xff]  ;;  %s1666_s21 = scalar_select %p1663_p6, 1, 0 }
 0x31a   : > { %v871_v49 = vpop.xlane.xlu1 %870  ;;  %v801_v42 = vpack.c.bf16 %v799_v41, %v798_v40 }
 0x31b   : > { %v874_v50 = vmul.f32 1.442695, %v872_v48  ;;  %v873_v51 = vsub.f32 %v865_v45, %v871_v49 }
 0x31d   : > { %2205 = vpow2.f32 %v874_v50  ;;  %v876_v52 = vmul.f32 1.442695, %v873_v51 }
 0x31e   : > { %v890_v53 = vpop.permute.xlu1 %889 }
 0x31f   : > { %2207 = vpow2.f32 %v876_v52  ;;  %2015 = vmatpush3.bf16.msra.mxu0 %v890_v53 }
 0x320   : > { %2026 = vmatprep.subr.bf16.mxu0 %v2340_v5 }
 0x327   : > { %v2206_v54 = vpop.eup %2205 }
 0x328   : > { %v878_v55 = vsel %vm814_vm9, %v2206_v54, 0.0 }
 0x329   : > { %v2208_v56 = vpop.eup %2207  ;;  %879 = vadd.xlane.f32.xlu1 %v878_v55 }
 0x32a   : > { %v881_v57 = vsel %vm814_vm9, %v2208_v56, 0.0 }
 0x32d   : > { %882 = vadd.xlane.f32.xlu1 %v881_v57 }
 0x33e   : > { %985 = vrot.lane.b32.xlu1 %v2645_v34, %s2344_s16 }
 0x342   : > { %983 = vrot.lane.b32.xlu1 %v2645_v34, %s2345_s3  ;;  %s2347_s3 = smov [#allocation5]  }
 0x3b6   : > { %v880_v58 = vpop.xlane.xlu1 %879 }
 0x3b7   : > { %2209 = vrcp.f32 %v880_v58 }
 0x3ba   : > { %v883_v59 = vpop.xlane.xlu1 %882 }
 0x3bb   : > { %2211 = vrcp.f32 %v883_v59  ;;  %v1909_v59 = vld [vmem:[%s2991_s18] ss:$0 sm:$0xff] }
 0x3be   : > { %v986_v0 = vpop.permute.xlu1 %985 }
 0x3bf   : > { %v991_v4 = vsel %vm814_vm9, %v986_v0, 0 }
 0x3c1   : > { %v2210_v60 = vpop.eup %2209 }
 0x3c2   : > { %v886_v62 = vmul.f32 %v2210_v60, %v2206_v54  ;;  %v984_v10 = vpop.permute.xlu1 %983 }
 0x3c5   : > { %v2212_v61 = vpop.eup %2211 }
 0x3c6   : > { %v887_v63 = vmul.f32 %v2212_v61, %v2208_v56 }
 0x3c8   : > { %v888_v3 = vpack.c.bf16 %v887_v63, %v886_v62 }
 0x3ca   : > { %2017 = vmatmul.mubr.msk.bf16.vlgmr.msra.gmra.mrb[4].mxu0 %vm814_vm9, %v888_v3 }
 0x3cb   : > { %2027 = vmatpush3.bf16.xpose.msra.mxu0 %v991_v4  ;;  %2028 = vmatprep.mubr.msk.bf16.mxu0 %vm2341_vm6, %v2340_v5 }
 0x3cc   : > { %2038 = vmatprep.subr.bf16.mxu0 %v2340_v5 }
 0x3d2   : > { %2029 = vmatmul.mubr.msk.bf16.vlgmr.msra.gmra.mrb[8].mxu0 %vm814_vm9, %v984_v10 }
 0x3d3   : > { %2040 = vmatprep.mubr.msk.bf16.mxu0 %vm2341_vm6, %v2340_v5  ;;  %2039 = vmatpush3.bf16.msra.mxu0 %v801_v42 }
 0x3d4   : > { %2080 = vmatprep.subr.bf16.mxu0 %v2340_v5 }
 0x49d   : > { %v929_v14 = vpop.f32.mrb[4].mxu0 }
 0x49e   : > { %v2018_v15 = vpop.f32.mrb[5].mxu0 }
 0x49f   : > { %v932_v16 = vpop.f32.mrb[6].mxu0 }
 0x4a0   : > { %v936_v17 = vpack.c.bf16 %v932_v16, %v929_v14  ;;  %v2019_v18 = vpop.f32.mrb[7].mxu0 }
 0x4a2   : > { %2023 = vmatmul.mubr.msk.bf16.vlgmr.msra.gmra.mrb[4].mxu1 %vm814_vm9, %v936_v17 }
 0x4a3   : > { %2034 = vmatprep.mubr.msk.bf16.mxu1 %vm2341_vm6, %v2340_v5 }
 0x4a5   : > { %v1027_v19 = vpop.f32.mrb[8].mxu0 }
 0x4a6   : > { %v1034_v20 = vmul.f32 0.25, %v1027_v19  ;;  %v2030_v21 = vpop.f32.mrb[9].mxu0 }
 0x4a7   : > { %v1030_v22 = vpop.f32.mrb[10].mxu0 }
 0x4a8   : > { %v1036_v25 = vsel %vm2571_vm3, %v1034_v20, -10000.0  ;;  %v1035_v26 = vmul.f32 0.25, %v1030_v22  ;;  %v2031_v27 = vpop.f32.mrb[11].mxu0 }
 0x4a9   : > { %v1038_v28 = vsel %vm814_vm9, %v1036_v25, -inf }
 0x4aa   : > { %v1037_v29 = vsel %vm2580_vm4, %v1035_v26, -10000.0  ;;  %1039 = vmax.xlane.f32.xlu0 %v1038_v28  ;;  %v1233_v26 = vld [vmem:[%s2587_s29 + $0x8] sm:$0xff]  ;;  %v1234_v28 = vld [vmem:[%s2587_s29 + $0x10] sm:$0xff] }
 0x4ab   : > { %v1041_v30 = vsel %vm814_vm9, %v1037_v29, -inf }
 0x4ac   : > { %1042 = vmax.xlane.f32.xlu1 %v1041_v30 }
 0x537   : > { %v1040_v31 = vpop.xlane.xlu0 %1039 }
 0x538   : > { %v1044_v32 = vsub.f32 %v1036_v25, %v1040_v31  ;;  %v1232_v25 = vld [vmem:[%s2587_s29] sm:$0xff] }
 0x539   : > { %v1043_v33 = vpop.xlane.xlu1 %1042  ;;  %v1236_v27 = vpack.c.bf16 %v1233_v26, %v1232_v25  ;;  %v1932_v31 = vld [vmem:[%s2596_s30 + $0x40] sm:$0xff]  ;;  %v1937_v26 = vld [vmem:[%s2596_s30 + $0x68] sm:$0xff] }
 0x53a   : > { %v1046_v35 = vmul.f32 1.442695, %v1044_v32  ;;  %v1045_v36 = vsub.f32 %v1037_v29, %v1043_v33  ;;  %v1235_v29 = vld [vmem:[%s2587_s29 + $0x18] sm:$0xff]  ;;  %v1933_v32 = vld [vmem:[%s2596_s30 + $0x48] sm:$0xff]  ;;  %v1934_v33 = vld [vmem:[%s2596_s30 + $0x50] sm:$0xff] }
 0x53b   : > { %v1237_v30 = vpack.c.bf16 %v1235_v29, %v1234_v28  ;;  %v1936_v25 = vld [vmem:[%s2596_s30 + $0x60] sm:$0xff]  ;;  %v1432_v28 = vld [vmem:[%s2596_s30 + $0x10] sm:$0xff]  ;;  %v1433_v29 = vld [vmem:[%s2596_s30 + $0x18] sm:$0xff] }
 0x53c   : > { %2213 = vpow2.f32 %v1046_v35  ;;  %v1048_v8 = vmul.f32 1.442695, %v1045_v36  ;;  %v1499_v35 = vpack.c.bf16 %v1933_v32, %v1932_v31  ;;  %v1935_v36 = vld [vmem:[%s2596_s30 + $0x58] sm:$0xff]  ;;  %v1938_v31 = vld [vmem:[%s2596_s30 + $0x70] sm:$0xff] }
 0x53d   : > { %v1939_v32 = vld [vmem:[%s2596_s30 + $0x78] sm:$0xff] }
 0x53e   : > { %2215 = vpow2.f32 %v1048_v8  ;;  %v1500_v8 = vpack.c.bf16 %v1935_v36, %v1934_v33  ;;  %v1502_v33 = vpack.c.bf16 %v1939_v32, %v1938_v31  ;;  %v1435_v36 = vld [vmem:[%s2596_s30 + $0x28] sm:$0xff] }
 0x546   : > { %v2214_v37 = vpop.eup %2213 }
 0x547   : > { %v1050_v38 = vsel %vm814_vm9, %v2214_v37, 0.0 }
 0x548   : > { %v2216_v39 = vpop.eup %2215  ;;  %1051 = vadd.xlane.f32.xlu0 %v1050_v38 }
 0x549   : > { %v1053_v9 = vsel %vm814_vm9, %v2216_v39, 0.0 }
 0x54c   : > { %1054 = vadd.xlane.f32.xlu0 %v1053_v9 }
 0x562   : > { %1061 = vrot.lane.b32.xlu0 %v2645_v34, %s2346_s0  ;;  %s2995_s0 = scalar_lea.vmem %s2940_s12, %s2516_s22 }
 0x575   : > { %v974_v43 = vpop.f32.mrb[4].mxu1 }
 0x576   : > { %v2024_v44 = vpop.f32.mrb[5].mxu1  ;;  %v981_v60 = vadd.f32 %v1909_v59, %v974_v43  ;;  %v1916_v43 = vld [vmem:[%s2992_s19] ss:$0 sm:$0xff]  ;;  %s2997_s19 = sld [smem:[#allocation10_spill]] }
 0x577   : > { %v977_v45 = vpop.f32.mrb[6].mxu1 }
 0x578   : > { %v2025_v46 = vpop.f32.mrb[7].mxu1  ;;  %v982_v62 = vadd.f32 %v1909_v59, %v977_v45  ;;  %v1917_v45 = vld [vmem:[%s2993_s17] ss:$0 sm:$0xff]  ;;  %s3000_s17 = smov %s2999_s24 }
 0x57c   : > { %s3001_s1 = sand.u32 1, %s2997_s19  }
 0x5d5   : > { %v1052_v47 = vpop.xlane.xlu0 %1051 }
 0x5d6   : > { %2217 = vrcp.f32 %v1052_v47 }
 0x5d9   : > { %v1055_v48 = vpop.xlane.xlu0 %1054 }
 0x5da   : > { %2219 = vrcp.f32 %v1055_v48 }
 0x5dd   : > { %v1062_v49 = vpop.permute.xlu0 %1061 }
 0x5de   : > { %2033 = vmatpush3.bf16.msra.mxu1 %v1062_v49 }
 0x5df   : > { %2044 = vmatprep.subr.bf16.mxu1 %v2340_v5 }
 0x5e0   : > { %v2218_v34 = vpop.eup %2217 }
 0x5e1   : > { %v1058_v51 = vmul.f32 %v2218_v34, %v2214_v37 }
 0x5e4   : > { %v2220_v50 = vpop.eup %2219 }
 0x5e5   : > { %v1059_v52 = vmul.f32 %v2220_v50, %v2216_v39 }
 0x5e7   : > { %v1060_v53 = vpack.c.bf16 %v1059_v52, %v1058_v51  ;;  %v2739_v52 = vadd.s32 4294967295, %v2510_v1  ;;  %v1945_v1 = vld [vmem:[%s2596_s30 + $0xa0] sm:$0xff] }
 0x5e9   : > { %2035 = vmatmul.mubr.msk.bf16.vlgmr.msra.gmra.mrb[8].mxu1 %vm814_vm9, %v1060_v53  ;;  %vm1219_vm11 = vcmp.ge.s32.totalorder %v2739_v52, 0 }
 0x5ea   : > { %2048 = vmatprep.mubr.msk.bf16.mxu1 %vm2341_vm6, %v2340_v5  ;;  %2045 = vmatpush3.bf16.msra.mxu1 %v1236_v27  ;;  %v1501_v27 = vpack.c.bf16 %v1937_v26, %v1936_v25 }
 0x5eb   : > { %2046 = vmatprep.subr.bf16.mxu1 %v2340_v5 }
 0x5ee   : > { %2047 = vmatpush3.bf16.msra.mxu1 %v1237_v30  ;;  %v1439_v30 = vpack.c.bf16 %v1433_v29, %v1432_v28 }
 0x5ef   : > { %2052 = vmatprep.subr.bf16.mxu1 %v2340_v5 }
 0x6bc   : > { %v1101_v54 = vpop.f32.mrb[8].mxu1 }
 0x6bd   : > { %v2036_v55 = vpop.f32.mrb[9].mxu1 }
 0x6be   : > { %v1104_v56 = vpop.f32.mrb[10].mxu1 }
 0x6bf   : > { %v1108_v57 = vpack.c.bf16 %v1104_v56, %v1101_v54  ;;  %v2037_v58 = vpop.f32.mrb[11].mxu1  ;;  %v1920_v56 = vld [vmem:[%s2587_s29 + $0x20] sm:$0xff] }
 0x6c1   : > { %2041 = vmatmul.mubr.msk.bf16.vlgmr.msra.gmra.mrb[12].mxu0 %vm814_vm9, %v1108_v57  ;;  %v1921_v57 = vld [vmem:[%s2587_s29 + $0x28] sm:$0xff] }
 0x6c2   : > { %2088 = vmatprep.mubr.msk.bf16.mxu0 %vm2341_vm6, %v2340_v5  ;;  %2081 = vmatpush3.bf16.msra.mxu0 %v1499_v35  ;;  %v1434_v35 = vld [vmem:[%s2596_s30 + $0x20] sm:$0xff] }
 0x6c3   : > { %2082 = vmatprep.subr.bf16.mxu0 %v2340_v5 }
 0x6c6   : > { %2083 = vmatpush3.bf16.msra.mxu0 %v1500_v8  ;;  %v1440_v8 = vpack.c.bf16 %v1435_v36, %v1434_v35 }
 0x6c7   : > { %2084 = vmatprep.subr.bf16.mxu0 %v2340_v5 }
 0x6ca   : > { %2085 = vmatpush3.bf16.msra.mxu0 %v1501_v27 }
 0x6cb   : > { %2086 = vmatprep.subr.bf16.mxu0 %v2340_v5 }
 0x6ce   : > { %2087 = vmatpush3.bf16.msra.mxu0 %v1502_v33 }
 0x6cf   : > { %2092 = vmatprep.subr.bf16.mxu0 %v2340_v5 }
 0x794   : > { %v1146_v61 = vpop.f32.mrb[12].mxu0 }
 0x795   : > { %v1153_v63 = vadd.f32 %v1146_v61, %v981_v60  ;;  %v2042_v0 = vpop.f32.mrb[13].mxu0  ;;  %v1290_v61 = vpack.c.bf16 %v1921_v57, %v1920_v56 }
 0x796   : > { %v1149_v3 = vpop.f32.mrb[14].mxu0  ;;  %v1923_v0 = vld [vmem:[%s2587_s29 + $0x38] sm:$0xff] }
 0x797   : > { %v1154_v4 = vadd.f32 %v1149_v3, %v982_v62  ;;  %v2043_v10 = vpop.f32.mrb[15].mxu0  ;;  %v1155_v11 = vadd.f32 %v1153_v63, %v2628_v23  ;;  %v1922_v63 = vld [vmem:[%s2587_s29 + $0x30] sm:$0xff] }
 0x798   : > { %v1291_v3 = vpack.c.bf16 %v1923_v0, %v1922_v63  ;;  %v1926_v10 = vld [vmem:[%s2587_s29 + $0x48] sm:$0xff] }
 0x799   : > { %v1159_v12 = vsel %vm748_vm7, %v1155_v11, 0.0  ;;  %v1156_v13 = vadd.f32 %v1154_v4, %v2631_v24  ;;  %v1925_v4 = vld [vmem:[%s2587_s29 + $0x40] sm:$0xff] }
 0x79a   : > { %1160 = vadd.xlane.f32.xlu0 %v1159_v12 }
 0x79b   : > { %v1162_v14 = vsel %vm748_vm7, %v1156_v13, 0.0 }
 0x79c   : > { %1163 = vadd.xlane.f32.xlu1 %v1162_v14  ;;  %v1928_v14 = vld [vmem:[%s2587_s29 + $0x58] sm:$0xff] }
 0x827   : > { %v1161_v15 = vpop.xlane.xlu0 %1160 }
 0x828   : > { %v1166_v16 = vmul.f32 0.03125, %v1161_v15 }
 0x829   : > { %v1164_v17 = vpop.xlane.xlu1 %1163 }
 0x82a   : > { %v1168_v18 = vsub.f32 %v1155_v11, %v1166_v16  ;;  %v1167_v19 = vmul.f32 0.03125, %v1164_v17  ;;  %v1363_v11 = vpack.c.bf16 %v1926_v10, %v1925_v4  ;;  %v2766_v16 = vadd.s32 1, %v2524_v2 }
 0x82c   : > { %v1169_v20 = vsub.f32 %v1156_v13, %v1167_v19  ;;  %v1170_v21 = vmul.f32 %v1168_v18, %v1168_v18  ;;  %v1927_v13 = vld [vmem:[%s2587_s29 + $0x50] sm:$0xff]  ;;  %vm1348_vm13 = vcmp.lt.s32.totalorder %v2766_v16, 16  ;;  %v1948_v16 = vld [vmem:[%s2596_s30 + $0xb8] sm:$0xff] }
 0x82d   : > { %v1364_v17 = vpack.c.bf16 %v1928_v14, %v1927_v13  ;;  %v1946_v14 = vld [vmem:[%s2596_s30 + $0xa8] sm:$0xff] }
 0x82e   : > { %v1172_v23 = vsel %vm748_vm7, %v1170_v21, 0.0  ;;  %v1171_v24 = vmul.f32 %v1169_v20, %v1169_v20  ;;  %v1567_v52 = vpack.c.bf16 %v1946_v14, %v1945_v1 }
 0x82f   : > { %1173 = vadd.xlane.f32.xlu1 %v1172_v23  ;;  %v1430_v23 = vld [vmem:[%s2596_s30] sm:$0xff] }
 0x830   : > { %v1175_v22 = vsel %vm748_vm7, %v1171_v24, 0.0  ;;  %v1431_v24 = vld [vmem:[%s2596_s30 + $0x8] sm:$0xff] }
 0x833   : > { %1176 = vadd.xlane.f32.xlu1 %v1175_v22  ;;  %v1438_v22 = vpack.c.bf16 %v1431_v24, %v1430_v23 }
 0x8bc   : > { %v1174_v37 = vpop.xlane.xlu1 %1173 }
 0x8bd   : > { %v1178_v38 = vmul.f32 0.03125, %v1174_v37  ;;  %v1436_v37 = vld [vmem:[%s2596_s30 + $0x30] sm:$0xff] }
 0x8bf   : > { %v1180_v39 = vadd.f32 1e-05, %v1178_v38  ;;  %v1437_v38 = vld [vmem:[%s2596_s30 + $0x38] sm:$0xff] }
 0x8c0   : > { %v1177_v9 = vpop.xlane.xlu1 %1176 }
 0x8c1   : > { %2221 = vrsqrt.f32 %v1180_v39  ;;  %v1179_v40 = vmul.f32 0.03125, %v1177_v9  ;;  %v1441_v39 = vpack.c.bf16 %v1437_v38, %v1436_v37  ;;  %v1918_v9 = vld [vmem:[%s2994_s26] ss:$0 sm:$0xff]  ;;  %s2876_s26 = scalar_lea.sflag [#allocation6], %s3001_s1 }
 0x8c3   : > { %v1181_v41 = vadd.f32 1e-05, %v1179_v40 }
 0x8c5   : > { %2223 = vrsqrt.f32 %v1181_v41 }
 0x8cb   : > { %v2222_v42 = vpop.eup %2221 }
 0x8cc   : > { %v1184_v44 = vmul.f32 %v2222_v42, %v1168_v18 }
 0x8ce   : > { %v1192_v46 = vmul.f32 %v1916_v43, %v1184_v44 }
 0x8cf   : > { %v2224_v47 = vpop.eup %2223 }
 0x8d0   : > { %v2732_v48 = vadd.f32 %v1917_v45, %v1192_v46  ;;  %v1185_v49 = vmul.f32 %v2224_v47, %v1169_v20 }
 0x8d2   : > { %v1193_v34 = vmul.f32 %v1916_v43, %v1185_v49  ;;  %v1202_v50 = vmul.f32 %v2566_v6, %v2732_v48 }
 0x8d4   : > { %v2736_v51 = vadd.f32 %v1917_v45, %v1193_v34  ;;  %v1212_v54 = vrot.slane %v1202_v50, 7  ;;  %v1338_v18 = vrot.slane %v1202_v50, 1  ;;  %v1941_v34 = vld [vmem:[%s2596_s30 + $0x80] sm:$0xff] }
 0x8d6   : > { %v1203_v53 = vmul.f32 %v2569_v7, %v2736_v51 }
 0x8d8   : > { %v1213_v55 = vrot.slane %v1203_v53, 7  ;;  %v1284_v12 = vpack.c.bf16 %v1203_v53, %v1202_v50  ;;  %v1339_v15 = vrot.slane %v1203_v53, 1  ;;  %v1942_v50 = vld [vmem:[%s2596_s30 + $0x88] sm:$0xff] }
 0x8da   : > { %v1215_v58 = vsel %vm1214_vm10, %v1212_v54, %v1213_v55  ;;  %v1216_v59 = vsel %vm1214_vm10, %v1213_v55, %v1212_v54  ;;  %v1342_v19 = vsel %vm1340_vm12, %v1339_v15, %v1338_v18  ;;  %v1341_v2 = vsel %vm1340_vm12, %v1338_v18, %v1339_v15  ;;  %v1947_v15 = vld [vmem:[%s2596_s30 + $0xb0] sm:$0xff] }
 0x8db   : > { %v1229_v60 = vsel %vm1219_vm11, %v1216_v59, 0.0  ;;  %v1356_v20 = vsel %vm1348_vm13, %v1342_v19, 0.0  ;;  %v1565_v55 = vpack.c.bf16 %v1942_v50, %v1941_v34  ;;  %v1950_v34 = vld [vmem:[%s687_s27] ss:$0 sm:$0xff]  ;;  %s1687_s27 = sshll.u32 %s2603_s5, 4  ;;  %s2870_s27 = int_to_ptr.vmem [resolvable:$true] %s1687_s27 }
 0x8dc   : > { %v1231_v62 = vpack.c.bf16 %v1215_v58, %v1229_v60  ;;  %v1357_v21 = vpack.c.bf16 %v1356_v20, %v1341_v2  ;;  %v1943_v60 = vld [vmem:[%s2596_s30 + $0x90] sm:$0xff]  ;;  %s2241_s16 = scalar_lea.vmem %s2870_s27, 256 }
 0x8dd   : > { %p2242_p7 = scmp.ne.s32.totalorder %s2870_s27, %s2241_s16 }
 0x8de   : > { %2049 = vmatmul.mubr.msk.bf16.vlgmr.msra.gmra.mrb[12].mxu1 %vm748_vm7, %v1231_v62 }
 0x8df   : > { %2053 = vmatpush3.bf16.msra.mxu1 %v1290_v61  ;;  %2056 = vmatprep.mubr.msk.bf16.mxu1 %vm2341_vm6, %v2340_v5  ;;  %v1944_v61 = vld [vmem:[%s2596_s30 + $0x98] sm:$0xff]  ;;  %s2996_s30 = sld [smem:[#allocation12_spill]]  ;;  %p2243_p9 = pnand %p2242_p7, %p2482_p8 }
 0x8e0   : > { %2054 = vmatprep.subr.bf16.mxu1 %v2340_v5 }
 0x8e1   : > { %p2244_p10 = pneg %p2243_p9 }
 0x8e3   : > { %2055 = vmatpush3.bf16.msra.mxu1 %v1291_v3 }
 0x8e4   : > { %2060 = vmatprep.subr.bf16.mxu1 %v2340_v5 }
 0x8e5   : > { %s1960_s23 = sshll.u32 %s2996_s30, 8 }
 0x8e6   : > { %s2868_s29 = scalar_lea.hbm %s2999_s24, %s1960_s23 }
 0x8ea   : > { %2057 = vmatmul.mubr.msk.bf16.vlgmr.msra.gmra.mrb[12].mxu1 %vm748_vm7, %v1284_v12 }
 0x8eb   : > { %2061 = vmatpush3.bf16.msra.mxu1 %v1363_v11  ;;  %2064 = vmatprep.mubr.msk.bf16.mxu1 %vm2341_vm6, %v2340_v5  ;;  %v1566_v11 = vpack.c.bf16 %v1944_v61, %v1943_v60 }
 0x8ec   : > { %2062 = vmatprep.subr.bf16.mxu1 %v2340_v5 }
 0x8ef   : > { %2063 = vmatpush3.bf16.msra.mxu1 %v1364_v17  ;;  %v1568_v17 = vpack.c.bf16 %v1948_v16, %v1947_v15 }
 0x8f0   : > { %2068 = vmatprep.subr.bf16.mxu1 %v2340_v5 }
 0x8f6   : > { %2065 = vmatmul.mubr.msk.bf16.vlgmr.msra.gmra.mrb[12].mxu1 %vm748_vm7, %v1357_v21  ;;  %v1930_v21 = vld [vmem:[%s2995_s0] ss:$0 sm:$0xff]  ;;  %s2245_s0 = sshll.u32 %s2347_s3, 4  ;;  %s2246_s0 = int_to_ptr.vmem [resolvable:$false] %s2245_s0 }
 0x8f7   : > { %2076 = vmatprep.mubr.msk.bf16.mxu1 %vm2341_vm6, %v2340_v5  ;;  %2069 = vmatpush3.bf16.msra.mxu1 %v1438_v22  ;;  %s2247_s30 = scalar_lea.vmem %s2246_s0, 512  ;;  %p2248_p11 = scmp.lt.s32.totalorder %s2870_s27, %s2246_s0 }
 0x8f8   : > { %2070 = vmatprep.subr.bf16.mxu1 %v2340_v5  ;;  %p2249_p12 = scmp.lt.s32.totalorder %s2247_s30, %s2241_s16 }
 0x8fa   : > { %p2250_p13 = por %p2249_p12, %p2248_p11 }
 0x8fb   : > { %2071 = vmatpush3.bf16.msra.mxu1 %v1439_v30 }
 0x8fc   : > { %2072 = vmatprep.subr.bf16.mxu1 %v2340_v5  ;;  %p2251_p1 = pnand %p2250_p13, %p2244_p10 }
 0x8ff   : > { %2073 = vmatpush3.bf16.msra.mxu1 %v1440_v8 }
 0x900   : > { %2074 = vmatprep.subr.bf16.mxu1 %v2340_v5 }
 0x903   : > { %2075 = vmatpush3.bf16.msra.mxu1 %v1441_v39 }
 0x9c9   : > { %v1402_v40 = vpop.f32.mrb[12].mxu1 }
 0x9ca   : > { %v2104_v41 = vadd.f32 %v1918_v9, %v1402_v40  ;;  %v2066_v42 = vpop.f32.mrb[13].mxu1 }
 0x9cb   : > { %v1405_v43 = vpop.f32.mrb[14].mxu1 }
 0x9cc   : > { %v1411_v44 = vmax.f32 %v2104_v41, 0.0  ;;  %v2105_v45 = vadd.f32 %v1918_v9, %v1405_v43  ;;  %v2067_v46 = vpop.f32.mrb[15].mxu1 }
 0x9ce   : > { %v1413_v47 = vmul.f32 %v2566_v6, %v1411_v44  ;;  %v1412_v49 = vmax.f32 %v2105_v45, 0.0 }
 0x9d0   : > { %v1414_v53 = vmul.f32 %v2569_v7, %v1412_v49  ;;  %v1423_v54 = vrot.slane %v1413_v47, 7  ;;  %v1549_v56 = vrot.slane %v1413_v47, 1 }
 0x9d2   : > { %v1424_v57 = vrot.slane %v1414_v53, 7  ;;  %v1489_v58 = vpack.c.bf16 %v1414_v53, %v1413_v47  ;;  %v1550_v59 = vrot.slane %v1414_v53, 1  ;;  %v1951_v53 = vld [vmem:[%s690_s28] ss:$0 sm:$0xff] }
 0x9d4   : > { %v1425_v62 = vsel %vm1214_vm10, %v1423_v54, %v1424_v57  ;;  %v1426_v63 = vsel %vm1214_vm10, %v1424_v57, %v1423_v54  ;;  %v1551_v0 = vsel %vm1340_vm12, %v1549_v56, %v1550_v59  ;;  %v1552_v3 = vsel %vm1340_vm12, %v1550_v59, %v1549_v56  ;;  %2089 = vmatmul.mubr.msk.bf16.vlgmr.msra.gmra.mrb[16].mxu0 %vm1442_vm14, %v1489_v58 }
 0x9d5   : > { %v1427_v4 = vsel %vm1219_vm11, %v1426_v63, 0.0  ;;  %v1554_v10 = vsel %vm1348_vm13, %v1552_v3, 0.0  ;;  %2093 = vmatpush3.bf16.msra.mxu0 %v1565_v55  ;;  %2100 = vmatprep.mubr.msk.bf16.mxu0 %vm2341_vm6, %v2340_v5  ;;  %v1667_v55 = vstv %s1666_s21 }
 0x9d6   : > { %v1429_v12 = vpack.c.bf16 %v1425_v62, %v1427_v4  ;;  %v1555_v13 = vpack.c.bf16 %v1554_v10, %v1551_v0  ;;  %2094 = vmatprep.subr.bf16.mxu0 %v2340_v5  ;;  %vm1668_vm15 = vcmp.eq.s32.totalorder %v1667_v55, 1 }
 0x9d8   : > { %2077 = vmatmul.mubr.msk.bf16.vlgmr.msra.gmra.mrb[16].mxu1 %vm1442_vm14, %v1429_v12 }
 0x9d9   : > { %2095 = vmatpush3.bf16.msra.mxu0 %v1566_v11 }
 0x9da   : > { %2096 = vmatprep.subr.bf16.mxu0 %v2340_v5 }
 0x9dd   : > { %2097 = vmatpush3.bf16.msra.mxu0 %v1567_v52 }
 0x9de   : > { %2098 = vmatprep.subr.bf16.mxu0 %v2340_v5 }
 0x9e1   : > { %2099 = vmatpush3.bf16.msra.mxu0 %v1568_v17 }
 0x9e4   : > { %2101 = vmatmul.mubr.msk.bf16.vlgmr.msra.gmra.mrb[16].mxu0 %vm1442_vm14, %v1555_v13 }
 0xaab   : > { %v1480_v18 = vpop.f32.mrb[16].mxu1 }
 0xaac   : > { %v2078_v19 = vpop.f32.mrb[17].mxu1  ;;  %v1487_v23 = vadd.f32 %v1930_v21, %v1480_v18 }
 0xaad   : > { %v1483_v2 = vpop.f32.mrb[18].mxu1 }
 0xaae   : > { %v2079_v20 = vpop.f32.mrb[19].mxu1  ;;  %v1488_v22 = vadd.f32 %v1930_v21, %v1483_v2 }
 0xab7   : > { %v1606_v24 = vpop.f32.mrb[16].mxu0 }
 0xab8   : > { %v2107_v25 = vadd.f32 %v1606_v24, %v1487_v23  ;;  %v2102_v26 = vpop.f32.mrb[17].mxu0 }
 0xab9   : > { %v1609_v27 = vpop.f32.mrb[18].mxu0 }
 0xaba   : > { %v1615_v5 = vmul.f32 %v2107_v25, %v2566_v6  ;;  %v2109_v28 = vadd.f32 %v1609_v27, %v1488_v22  ;;  %v2103_v29 = vpop.f32.mrb[19].mxu0 }
 0xabc   : > { %v1616_v30 = vmul.f32 %v2109_v28, %v2569_v7  ;;  %v1617_v31 = vadd.f32 %v1615_v5, %v2732_v48 }
 0xabe   : > { %v1621_v32 = vsel %vm748_vm7, %v1617_v31, 0.0  ;;  %v1618_v33 = vadd.f32 %v1616_v30, %v2736_v51 }
 0xabf   : > { %1622 = vadd.xlane.f32.xlu1 %v1621_v32 }
 0xac0   : > { %v1624_v35 = vsel %vm748_vm7, %v1618_v33, 0.0 }
 0xac3   : > { %1625 = vadd.xlane.f32.xlu1 %v1624_v35 }
 0xb4c   : > { %v1623_v36 = vpop.xlane.xlu1 %1622 }
 0xb4d   : > { %v1627_v8 = vmul.f32 0.03125, %v1623_v36 }
 0xb4f   : > { %v1629_v37 = vsub.f32 %v1617_v31, %v1627_v8 }
 0xb50   : > { %v1626_v38 = vpop.xlane.xlu1 %1625 }
 0xb51   : > { %v1628_v39 = vmul.f32 0.03125, %v1626_v38  ;;  %v1631_v9 = vmul.f32 %v1629_v37, %v1629_v37 }
 0xb53   : > { %v1630_v40 = vsub.f32 %v1618_v33, %v1628_v39  ;;  %v1633_v41 = vsel %vm748_vm7, %v1631_v9, 0.0 }
 0xb54   : > { %1634 = vadd.xlane.f32.xlu1 %v1633_v41 }
 0xb55   : > { %v1632_v48 = vmul.f32 %v1630_v40, %v1630_v40 }
 0xb57   : > { %v1636_v51 = vsel %vm748_vm7, %v1632_v48, 0.0 }
 0xb58   : > { %1637 = vadd.xlane.f32.xlu1 %v1636_v51 }
 0xbe1   : > { %v1635_v42 = vpop.xlane.xlu1 %1634 }
 0xbe2   : > { %v1639_v43 = vmul.f32 0.03125, %v1635_v42 }
 0xbe4   : > { %v1641_v44 = vadd.f32 1e-05, %v1639_v43 }
 0xbe5   : > { %v1638_v45 = vpop.xlane.xlu1 %1637 }
 0xbe6   : > { %2225 = vrsqrt.f32 %v1641_v44  ;;  %v1640_v46 = vmul.f32 0.03125, %v1638_v45 }
 0xbe8   : > { %v1642_v47 = vadd.f32 1e-05, %v1640_v46 }
 0xbea   : > { %2227 = vrsqrt.f32 %v1642_v47 }
 0xbf0   : > { %v2226_v49 = vpop.eup %2225 }
 0xbf1   : > { %v1645_v50 = vmul.f32 %v2226_v49, %v1629_v37 }
 0xbf3   : > { %v1653_v54 = vmul.f32 %v1950_v34, %v1645_v50 }
 0xbf4   : > { %v2228_v56 = vpop.eup %2227 }
 0xbf5   : > { %v1661_v57 = vadd.f32 %v1951_v53, %v1653_v54  ;;  %v1646_v58 = vmul.f32 %v2228_v56, %v1630_v40 }
 0xbf7   : > { %v1654_v59 = vmul.f32 %v1950_v34, %v1646_v58  ;;  %v1664_v60 = vmul.f32 %v2566_v6, %v1661_v57 }
 0xbf9   : > { %v1662_v61 = vadd.f32 %v1951_v53, %v1654_v59  ;;  %v1669_v62 = vsel %vm1668_vm15, %v1664_v60, %v1661_v57 }
 0xbfa   : > { %1671 = vst.msk [vmem:[%s2603_s5] sm:$0xff] %vm748_vm7, %v1669_v62 }
 0xbfb   : > { %v1665_v63 = vmul.f32 %v2569_v7, %v1662_v61 }
 0xbfd   : > { %v1670_v0 = vsel %vm1668_vm15, %v1665_v63, %v1662_v61 }
 0xbfe   : > { %1672 = vst.msk [vmem:[%s2603_s5 + $0x8] sm:$0xff] %vm748_vm7, %v1670_v0 }
 0xbff   : > { %2254 = shalt.err (!%p2251_p1)
}
 0xc00   : > { %s2255_s5 = scalar_lea.hbm %s2868_s29, 256  ;;  %s2259_s18 = scalar_lea.hbm %s3000_s17, 512 }
 0xc01   : > { %p2256_p2 = scmp.ne.s32.totalorder %s2868_s29, %s2255_s5  ;;  %p2260_p5 = scmp.lt.u32.totalorder %s2868_s29, %s3000_s17 }
 0xc02   : > { %p2261_p6 = scmp.lt.u32.totalorder %s2259_s18, %s2255_s5  ;;  %p2263_p9 = scmp.lt.u32.totalorder %s2255_s5, %s2868_s29 }
 0xc03   : > { %p2257_p3 = pnand %p2256_p2, %p2482_p8 }
 0xc04   : > { %p2262_p7 = por %p2261_p6, %p2260_p5 }
 0xc05   : > { %p2258_p4 = pneg %p2257_p3 }
 0xc06   : > { %p2264_p10 = por %p2263_p9, %p2262_p7 }
 0xc08   : > { %p2265_p11 = pnand %p2264_p10, %p2258_p4 }
 0xc0a   : > { %2268 = shalt.err (!%p2265_p11)
}
 0xc0b   : > { %s2348_s19 = smov 128   ;;  %s2349_s23 = smov 8  }
 0xc0c   : > { %2124 = dma.vmem_to_hbm [thread:$0]  (%p2482_p8), %s2870_s27, 256, %s2868_s29, %s2876_s26, %s2348_s19, %s2348_s19, %s2349_s23  }
 0xc0d PF: > { %s3002_s22 = sld [smem:[#allocation15_spill]]  ;;  %s3003_s28 = sld [smem:[#allocation9_spill]] }
 0xc13   : > { %p2130_p12 = scmp.ge.s32.totalorder %s3002_s22, 2  ;;  %s1702_s1 = sand.u32 1, %s3003_s28  }
 0xc14   : > { %s1703_s16 = scalar_lea.sflag [#allocation6], %s1702_s1 }
 0xc15   : > { %p2127_p13 = pnand %p2130_p12, %p2492_p0 }
 0xc17   : > { %2304 = dma.done.wait (!%p2127_p13), %s1703_s16, 256  }
 0xc18   : > { %2306 = vsyncadd (!%p2127_p13), %s1703_s16, 4294967040  ;;  %s34_s29 = sadd.s32 1, %s3002_s22   ;;  %s3005_s23 = sld [smem:[#allocation10_spill]] }
 0xc19   : > { %p31_p1 = scmp.ge.s32.totalorder %s34_s29, 6   ;;  %s3006_s24 = sld [smem:[#allocation11_spill]] }
 0xc1a   : > { %s3007_s0 = sld [smem:[#allocation20_spill]]  ;;  %s3008_s25 = sld [smem:[#allocation13_spill]] }
 0xc1b   : > { %s3009_s26 = sld [smem:[#allocation14_spill]]  ;;  %s3010_s27 = sld [smem:[#allocation16_spill]] }
 0xc1c   : > { %s3011_s28 = sld [smem:[#allocation18_spill]]  ;;  %33 = sbr.rel (!%p31_p1) target bundleno = 22 (0x16), region = 158 }
 0xc23   :  { %1708 = vsyncpa [#allocation6], 1 }
 0xc24   :  { %1710 = vsyncpa [#allocation6 + $0x1], 1 }

</bundles_post_ra>
